<compile_context>
chip_gen: v7x
topology: tpu7x:2x2x1
jax: 0.10.0
libtpu: 0.0.40
codegen_flags: <defaults>
</compile_context>

<pallas_src>
import jax
import jax.numpy as jnp
from jax import lax
from jax.experimental import pallas as pl
from jax.experimental.pallas import tpu as pltpu

EPS = 1e-5


def _bn_affine(p):
    scale = p["gamma"] / jnp.sqrt(p["var"] + EPS)
    shift = p["beta"] - p["mean"] * scale
    return scale, shift


def _pick_tile_rows(R, planes):
    # Keep the per-tile f32 accumulator around <=64 KB so it stays
    # register/near-register resident across the 9 accumulated dots.
    tr = (64 * 1024) // max(1, planes * 4)
    tr = min(tr, 512, R)
    tr = max(8, (tr // 8) * 8)
    return tr


# --------------------------------------------------------------------------
# Kernel A: conv1 (3x3, stride s, pad 1) on relu(bn1(x)) phases
#           + fused bn2+relu epilogue (writes conv2's zero-padded input)
#           + fused 1x1-stride shortcut projection (projection blocks only).
# All activation refs are (1, rows, channels) blocks; taps are contiguous
# row slices.  Accumulation is row-tiled.
# --------------------------------------------------------------------------
def _make_conv1_kernel(stride, Ho, Wo, PW, PH, planes, proj, tile_rows):
    R = Ho * PW
    PHB = Ho + 3
    lead = PW + 1                  # leading pad rows of z1p
    trail = PHB * PW - lead - R    # trailing pad rows (= 2*PW - 1)

    def body(ph_ref, w1_ref, s2_ref, b2_ref, *rest):
        if proj:
            wsc_ref, z1p_ref, sc_ref = rest
        else:
            (z1p_ref,) = rest

        # Zero ONLY the padding rows of conv2's input (not the whole block).
        z1p_ref[0, pl.ds(0, lead), :] = jnp.zeros((lead, planes),
                                                  z1p_ref.dtype)
        z1p_ref[0, pl.ds(lead + R, trail), :] = jnp.zeros((trail, planes),
                                                          z1p_ref.dtype)

        s2 = s2_ref[...]
        b2 = b2_ref[...]

        # Row-tiled 9-tap accumulation: acc = (tr, planes) f32 stays small.
        for r0 in range(0, R, tile_rows):
            tr = min(tile_rows, R - r0)
            acc = jnp.zeros((tr, planes), jnp.float32)
            for ky in range(3):
                for kx in range(3):
                    p = (ky % stride) * stride + (kx % stride)
                    start = (p * PH * PW + (ky // stride) * PW
                             + (kx // stride) + r0)
                    tap = ph_ref[0, pl.ds(start, tr), :]      # (tr, Cin) bf16
                    acc = acc + jnp.dot(tap, w1_ref[ky * 3 + kx],
                                        preferred_element_type=jnp.float32)

            # bn2 + relu; zero the 2 garbage columns of each wide row so they
            # become exactly the zero padding conv2 expects.  Mask is built
            # in-kernel (cheap VPU int ops) instead of DMA'd every step.
            col = (lax.broadcasted_iota(jnp.int32, (tr, 1), 0) + r0) % PW
            z1 = jnp.maximum(acc * s2 + b2, 0.0)
            z1 = jnp.where(col < Wo, z1, 0.0)
            # Single contiguous store at offset PW+1 lands every value at
            # padded coordinate (h+1, w+1) of conv2's input.
            z1p_ref[0, pl.ds(lead + r0, tr), :] = z1.astype(z1p_ref.dtype)

            if proj:
                pc = (1 % stride) * stride + (1 % stride)
                start_sc = (pc * PH * PW + (1 // stride) * PW
                            + (1 // stride) + r0)
                tap_sc = ph_ref[0, pl.ds(start_sc, tr), :]
                sc = jnp.dot(tap_sc, wsc_ref[...],
                             preferred_element_type=jnp.float32)
                sc_ref[0, pl.ds(r0, tr), :] = sc.astype(sc_ref.dtype)

    return body


# --------------------------------------------------------------------------
# Kernel B: conv2 (3x3, stride 1, pad 1) on the padded z1 + residual add.
# --------------------------------------------------------------------------
def _make_conv2_kernel(Ho, PW, planes, tile_rows):
    R = Ho * PW

    def body(z1p_ref, w2_ref, sc_ref, o_ref):
        for r0 in range(0, R, tile_rows):
            tr = min(tile_rows, R - r0)
            acc = jnp.zeros((tr, planes), jnp.float32)
            for ky in range(3):
                for kx in range(3):
                    tap = z1p_ref[0, pl.ds(ky * PW + kx + r0, tr), :]
                    acc = acc + jnp.dot(tap, w2_ref[ky * 3 + kx],
                                        preferred_element_type=jnp.float32)
            sc = sc_ref[0, pl.ds(r0, tr), :].astype(jnp.float32)
            o_ref[0, pl.ds(r0, tr), :] = acc + sc

    return body


# --------------------------------------------------------------------------
# Full block forward (NCHW in / NCHW out, like the PyTorch module).
# --------------------------------------------------------------------------
def preact_block_v2_forward(x_nchw, params, stride):
    N, Cin, H, W = x_nchw.shape
    planes = params["conv1_w"].shape[0]
    s = int(stride)
    proj = (s != 1) or (Cin != planes)

    Ho = (H + 2 - 3) // s + 1
    Wo = (W + 2 - 3) // s + 1
    PW = Wo + 2                      # wide-row width (valid cols [0, Wo))
    PH = Ho + (2 // s) + 1           # phase rows (incl. extra zero row)
    PHB = Ho + 3                     # padded-z1 rows for conv2
    S2 = s * s
    R = Ho * PW
    tile_rows = _pick_tile_rows(R, planes)

    # TODO(synk): in a full network, keep activations NHWC end-to-end (one
    # NCHW<->NHWC transpose at model entry/exit) and fuse bn1+relu+pad+
    # polyphase packing into kernel A; here the module's NCHW interface keeps
    # this glue as one fused XLA elementwise/pad/transpose pass per block.
    x_nhwc = jnp.transpose(x_nchw, (0, 2, 3, 1)).astype(jnp.float32)

    # ---- glue: pre = relu(bn1(x)), zero-pad, polyphase pack, cast bf16 ----
    sc1, sh1 = _bn_affine(params["bn1"])
    pre = jnp.maximum(x_nhwc * sc1 + sh1, 0.0)
    pad_b = s * PH - H - 1
    pad_r = s * PW - W - 1
    prep = jnp.pad(pre, ((0, 0), (1, pad_b), (1, pad_r), (0, 0)))
    phases = prep.reshape(N, PH, s, PW, s, Cin)
    phases = phases.transpose(0, 2, 4, 1, 3, 5).reshape(N, S2 * PH * PW, Cin)
    phases = phases.astype(jnp.bfloat16)

    # ---- weights / bn2 affine -------------------------------------------
    w1 = jnp.transpose(params["conv1_w"], (2, 3, 1, 0)).reshape(9, Cin, planes)
    w1 = w1.astype(jnp.bfloat16)
    w2 = jnp.transpose(params["conv2_w"], (2, 3, 1, 0)).reshape(9, planes,
                                                                planes)
    w2 = w2.astype(jnp.bfloat16)
    sc2, sh2 = _bn_affine(params["bn2"])
    s2v = sc2.reshape(1, planes).astype(jnp.float32)
    b2v = sh2.reshape(1, planes).astype(jnp.float32)

    def cparams(step_bytes):
        # double buffering + slack, capped below v7x's 64 MiB physical VMEM.
        lim = int(min(56 << 20, max(16 << 20, 2 * step_bytes + (4 << 20))))
        return pltpu.CompilerParams(dimension_semantics=("parallel",),
                                    vmem_limit_bytes=lim)

    # ---- kernel A: conv1 + bn2 + relu (+ shortcut projection) -----------
    a_step_bytes = (S2 * PH * PW * Cin * 2 + 9 * Cin * planes * 2
                    + 2 * planes * 4 + PHB * PW * planes * 2
                    + (R * planes * 2 + Cin * planes * 2 if proj else 0))
    a_kernel = _make_conv1_kernel(s, Ho, Wo, PW, PH, planes, proj, tile_rows)
    a_in_specs = [
        pl.BlockSpec((1, S2 * PH * PW, Cin), lambda n: (n, 0, 0)),
        pl.BlockSpec((9, Cin, planes), lambda n: (0, 0, 0)),
        pl.BlockSpec((1, planes), lambda n: (0, 0)),
        pl.BlockSpec((1, planes), lambda n: (0, 0)),
    ]
    a_args = [phases, w1, s2v, b2v]
    z1p_shape = jax.ShapeDtypeStruct((N, PHB * PW, planes), jnp.bfloat16)
    z1p_spec = pl.BlockSpec((1, PHB * PW, planes), lambda n: (n, 0, 0))

    if proj:
        wsc = params["sc_conv_w"].T.astype(jnp.bfloat16)     # (Cin, planes)
        a_in_specs.append(pl.BlockSpec((Cin, planes), lambda n: (0, 0)))
        a_args.append(wsc)
        z1p, sc_in = pl.pallas_call(
            a_kernel,
            out_shape=(z1p_shape,
                       jax.ShapeDtypeStruct((N, R, planes), jnp.bfloat16)),
            grid=(N,),
            in_specs=a_in_specs,
            out_specs=(z1p_spec,
                       pl.BlockSpec((1, R, planes), lambda n: (n, 0, 0))),
            compiler_params=cparams(a_step_bytes),
        )(*a_args)
    else:
        z1p = pl.pallas_call(
            a_kernel,
            out_shape=z1p_shape,
            grid=(N,),
            in_specs=a_in_specs,
            out_specs=z1p_spec,
            compiler_params=cparams(a_step_bytes),
        )(*a_args)
        # identity shortcut: the ORIGINAL x, on the same wide grid, bf16.
        sc_in = jnp.pad(x_nhwc, ((0, 0), (0, 0), (0, PW - W), (0, 0)))
        sc_in = sc_in.reshape(N, R, planes).astype(jnp.bfloat16)

    # ---- kernel B: conv2 + residual add ----------------------------------
    b_step_bytes = (PHB * PW * planes * 2 + 9 * planes * planes * 2
                    + R * planes * 2 + R * planes * 4)
    b_kernel = _make_conv2_kernel(Ho, PW, planes, tile_rows)
    out_wide = pl.pallas_call(
        b_kernel,
        out_shape=jax.ShapeDtypeStruct((N, R, planes), jnp.float32),
        grid=(N,),
        in_specs=[
            pl.BlockSpec((1, PHB * PW, planes), lambda n: (n, 0, 0)),
            pl.BlockSpec((9, planes, planes), lambda n: (0, 0, 0)),
            pl.BlockSpec((1, R, planes), lambda n: (n, 0, 0)),
        ],
        out_specs=pl.BlockSpec((1, R, planes), lambda n: (n, 0, 0)),
        compiler_params=cparams(b_step_bytes),
    )(z1p, w2, sc_in)

    # crop the 2 garbage columns (fuses with the layout transpose) -> NCHW.
    out = out_wide.reshape(N, Ho, PW, planes)[:, :, :Wo, :]
    return jnp.transpose(out, (0, 3, 1, 2))


# ----------------------------- parameter setup -----------------------------
def init_params(key, in_planes, planes, stride):
    ks = jax.random.split(key, 5)

    def bn(k, c):
        k1, k2, k3, k4 = jax.random.split(k, 4)
        return dict(
            gamma=jax.random.uniform(k1, (c,), jnp.float32, 0.5, 1.5),
            beta=jax.random.normal(k2, (c,), jnp.float32) * 0.1,
            mean=jax.random.normal(k3, (c,), jnp.float32) * 0.1,
            var=jax.random.uniform(k4, (c,), jnp.float32, 0.5, 1.5))

    p = dict(
        bn1=bn(ks[0], in_planes),
        conv1_w=jax.random.normal(ks[1], (planes, in_planes, 3, 3),
                                  jnp.float32) * 0.1,
        bn2=bn(ks[2], planes),
        conv2_w=jax.random.normal(ks[3], (planes, planes, 3, 3),
                                  jnp.float32) * 0.1,
    )
    if stride != 1 or in_planes != planes:
        p["sc_conv_w"] = jax.random.normal(ks[4], (planes, in_planes),
                                           jnp.float32) * 0.2
    return p


# ------------------------- pure-JAX reference check -------------------------
def reference_forward(x, params, stride):
    hp = jax.lax.Precision.HIGHEST

    def bn(v, p):
        s, b = _bn_affine(p)
        return v * s[None, :, None, None] + b[None, :, None, None]

    pre = jax.nn.relu(bn(x, params["bn1"]))
    if "sc_conv_w" in params:
        shortcut = jax.lax.conv_general_dilated(
            pre, params["sc_conv_w"][:, :, None, None], (stride, stride),
            "VALID", dimension_numbers=("NCHW", "OIHW", "NCHW"), precision=hp)
    else:
        shortcut = x
    out = jax.lax.conv_general_dilated(
        pre, params["conv1_w"], (stride, stride), ((1, 1), (1, 1)),
        dimension_numbers=("NCHW", "OIHW", "NCHW"), precision=hp)
    out = jax.nn.relu(bn(out, params["bn2"]))
    out = jax.lax.conv_general_dilated(
        out, params["conv2_w"], (1, 1), ((1, 1), (1, 1)),
        dimension_numbers=("NCHW", "OIHW", "NCHW"), precision=hp)
    return out + shortcut


if __name__ == "__main__":
    # TODO(synk): BatchNorm is applied in inference form (folded running
    # stats); training-mode batch-statistics updates are not implemented.
    key = jax.random.PRNGKey(0)
    kx1, kp1, kx2, kp2, kx3, kp3 = jax.random.split(key, 6)

    N = 2
    configs = [
        # (in_planes, planes, stride, H, W)
        (8, 16, 2, 16, 16),    # projection shortcut, stride 2
        (16, 16, 1, 16, 16),   # identity shortcut
        (8, 16, 1, 16, 16),    # projection shortcut, stride 1
    ]
    key_pairs = [(kx1, kp1), (kx2, kp2), (kx3, kp3)]

    for (cin, planes, stride, H, W), (kx, kp) in zip(configs, key_pairs):
        x = jax.random.normal(kx, (N, cin, H, W), jnp.float32)
        params = init_params(kp, cin, planes, stride)
        out = preact_block_v2_forward(x, params, stride)
        jax.block_until_ready(out)
        ref = reference_forward(x, params, stride)
        Ho = (H + 2 - 3) // stride + 1
        Wo = (W + 2 - 3) // stride + 1
        assert out.shape == (N, planes, Ho, Wo), out.shape
        # bf16 matmuls / bf16 shortcut carry vs f32-HIGHEST reference.
        assert jnp.allclose(out, ref, atol=5e-2, rtol=5e-2), \
            float(jnp.max(jnp.abs(out - ref)))

    print("KERNEL_OK")
</pallas_src>

<mosaic_0001>
module attributes {stable_mosaic.version = 11 : i64} {
  func.func @body(%arg0: i32, %arg1: memref<1x400x8xbf16, #tpu.memory_space<vmem>>, %arg2: memref<9x8x16xbf16, #tpu.memory_space<vmem>>, %arg3: memref<1x16xf32, #tpu.memory_space<vmem>>, %arg4: memref<1x16xf32, #tpu.memory_space<vmem>>, %arg5: memref<8x16xbf16, #tpu.memory_space<vmem>>, %arg6: memref<1x110x16xbf16, #tpu.memory_space<vmem>>, %arg7: memref<1x80x16xbf16, #tpu.memory_space<vmem>>) attributes {dimension_semantics = [#tpu.dimension_semantics<parallel>], iteration_bounds = array<i64: 2>, scalar_prefetch = 0 : i64, scratch_operands = 0 : i64, tpu.core_type = #tpu.core_type<tc>, window_params = [{transform_indices = @transform_0, window_bounds = array<i64: 1, 400, 8>}, {pipeline_mode = #tpu.pipeline_mode<synchronous>, transform_indices = @transform_1, window_bounds = array<i64: 9, 8, 16>}, {pipeline_mode = #tpu.pipeline_mode<synchronous>, transform_indices = @transform_2, window_bounds = array<i64: 1, 16>}, {pipeline_mode = #tpu.pipeline_mode<synchronous>, transform_indices = @transform_3, window_bounds = array<i64: 1, 16>}, {pipeline_mode = #tpu.pipeline_mode<synchronous>, transform_indices = @transform_4, window_bounds = array<i64: 8, 16>}, {transform_indices = @transform_5, window_bounds = array<i64: 1, 110, 16>}, {transform_indices = @transform_6, window_bounds = array<i64: 1, 80, 16>}]} {
    %cst = arith.constant 0.000000e+00 : bf16
    %0 = vector.broadcast %cst : bf16 to vector<11x16xbf16>
    %c0 = arith.constant 0 : index
    %c0_0 = arith.constant 0 : index
    %c0_1 = arith.constant 0 : index
    %1 = vector.load %arg6[%c0, %c0_0, %c0_1] : memref<1x110x16xbf16, #tpu.memory_space<vmem>>, vector<1x11x16xbf16>
    %2 = vector.shape_cast %1 : vector<1x11x16xbf16> to vector<11x16xbf16>
    %3 = vector.shape_cast %0 : vector<11x16xbf16> to vector<1x11x16xbf16>
    tpu.vector_store %arg6[%c0, %c0_0, %c0_1], %3 {strides = array<i32>} : memref<1x110x16xbf16, #tpu.memory_space<vmem>>, vector<1x11x16xbf16>,
    %cst_2 = arith.constant 0.000000e+00 : bf16
    %4 = vector.broadcast %cst_2 : bf16 to vector<19x16xbf16>
    %c0_3 = arith.constant 0 : index
    %c91 = arith.constant 91 : index
    %c0_4 = arith.constant 0 : index
    %5 = vector.load %arg6[%c0_3, %c91, %c0_4] : memref<1x110x16xbf16, #tpu.memory_space<vmem>>, vector<1x19x16xbf16>
    %6 = vector.shape_cast %5 : vector<1x19x16xbf16> to vector<19x16xbf16>
    %7 = vector.shape_cast %4 : vector<19x16xbf16> to vector<1x19x16xbf16>
    tpu.vector_store %arg6[%c0_3, %c91, %c0_4], %7 {strides = array<i32>} : memref<1x110x16xbf16, #tpu.memory_space<vmem>>, vector<1x19x16xbf16>,
    %c0_5 = arith.constant 0 : index
    %c0_6 = arith.constant 0 : index
    %8 = vector.load %arg3[%c0_5, %c0_6] : memref<1x16xf32, #tpu.memory_space<vmem>>, vector<1x16xf32>
    %c0_7 = arith.constant 0 : index
    %c0_8 = arith.constant 0 : index
    %9 = vector.load %arg4[%c0_7, %c0_8] : memref<1x16xf32, #tpu.memory_space<vmem>>, vector<1x16xf32>
    %cst_9 = arith.constant 0.000000e+00 : f32
    %10 = vector.broadcast %cst_9 : f32 to vector<80x16xf32>
    %c0_10 = arith.constant 0 : index
    %c0_11 = arith.constant 0 : index
    %c0_12 = arith.constant 0 : index
    %11 = vector.load %arg1[%c0_10, %c0_11, %c0_12] : memref<1x400x8xbf16, #tpu.memory_space<vmem>>, vector<1x80x8xbf16>
    %12 = vector.shape_cast %11 : vector<1x80x8xbf16> to vector<80x8xbf16>
    %c0_13 = arith.constant 0 : index
    %c0_14 = arith.constant 0 : index
    %c0_15 = arith.constant 0 : index
    %13 = vector.load %arg2[%c0_13, %c0_14, %c0_15] : memref<9x8x16xbf16, #tpu.memory_space<vmem>>, vector<1x8x16xbf16>
    %14 = vector.shape_cast %13 : vector<1x8x16xbf16> to vector<8x16xbf16>
    %cst_16 = arith.constant dense<0.000000e+00> : vector<80x16xf32>
    %15 = tpu.matmul %12, %14, %cst_16 {dimension_numbers = #tpu.dot_dimension_numbers<[1], [0], [0], [1], [0, 0, 1, 1], [], []>} : vector<80x8xbf16>, vector<8x16xbf16>, vector<80x16xf32> -> vector<80x16xf32>
    %16 = arith.addf %10, %15 : vector<80x16xf32>
    %c0_17 = arith.constant 0 : index
    %c100 = arith.constant 100 : index
    %c0_18 = arith.constant 0 : index
    %17 = vector.load %arg1[%c0_17, %c100, %c0_18] : memref<1x400x8xbf16, #tpu.memory_space<vmem>>, vector<1x80x8xbf16>
    %18 = vector.shape_cast %17 : vector<1x80x8xbf16> to vector<80x8xbf16>
    %c1 = arith.constant 1 : index
    %c0_19 = arith.constant 0 : index
    %c0_20 = arith.constant 0 : index
    %19 = vector.load %arg2[%c1, %c0_19, %c0_20] : memref<9x8x16xbf16, #tpu.memory_space<vmem>>, vector<1x8x16xbf16>
    %20 = vector.shape_cast %19 : vector<1x8x16xbf16> to vector<8x16xbf16>
    %cst_21 = arith.constant dense<0.000000e+00> : vector<80x16xf32>
    %21 = tpu.matmul %18, %20, %cst_21 {dimension_numbers = #tpu.dot_dimension_numbers<[1], [0], [0], [1], [0, 0, 1, 1], [], []>} : vector<80x8xbf16>, vector<8x16xbf16>, vector<80x16xf32> -> vector<80x16xf32>
    %22 = arith.addf %16, %21 : vector<80x16xf32>
    %c0_22 = arith.constant 0 : index
    %c1_23 = arith.constant 1 : index
    %c0_24 = arith.constant 0 : index
    %23 = vector.load %arg1[%c0_22, %c1_23, %c0_24] : memref<1x400x8xbf16, #tpu.memory_space<vmem>>, vector<1x80x8xbf16>
    %24 = vector.shape_cast %23 : vector<1x80x8xbf16> to vector<80x8xbf16>
    %c2 = arith.constant 2 : index
    %c0_25 = arith.constant 0 : index
    %c0_26 = arith.constant 0 : index
    %25 = vector.load %arg2[%c2, %c0_25, %c0_26] : memref<9x8x16xbf16, #tpu.memory_space<vmem>>, vector<1x8x16xbf16>
    %26 = vector.shape_cast %25 : vector<1x8x16xbf16> to vector<8x16xbf16>
    %cst_27 = arith.constant dense<0.000000e+00> : vector<80x16xf32>
    %27 = tpu.matmul %24, %26, %cst_27 {dimension_numbers = #tpu.dot_dimension_numbers<[1], [0], [0], [1], [0, 0, 1, 1], [], []>} : vector<80x8xbf16>, vector<8x16xbf16>, vector<80x16xf32> -> vector<80x16xf32>
    %28 = arith.addf %22, %27 : vector<80x16xf32>
    %c0_28 = arith.constant 0 : index
    %c200 = arith.constant 200 : index
    %c0_29 = arith.constant 0 : index
    %29 = vector.load %arg1[%c0_28, %c200, %c0_29] : memref<1x400x8xbf16, #tpu.memory_space<vmem>>, vector<1x80x8xbf16>
    %30 = vector.shape_cast %29 : vector<1x80x8xbf16> to vector<80x8xbf16>
    %c3 = arith.constant 3 : index
    %c0_30 = arith.constant 0 : index
    %c0_31 = arith.constant 0 : index
    %31 = vector.load %arg2[%c3, %c0_30, %c0_31] : memref<9x8x16xbf16, #tpu.memory_space<vmem>>, vector<1x8x16xbf16>
    %32 = vector.shape_cast %31 : vector<1x8x16xbf16> to vector<8x16xbf16>
    %cst_32 = arith.constant dense<0.000000e+00> : vector<80x16xf32>
    %33 = tpu.matmul %30, %32, %cst_32 {dimension_numbers = #tpu.dot_dimension_numbers<[1], [0], [0], [1], [0, 0, 1, 1], [], []>} : vector<80x8xbf16>, vector<8x16xbf16>, vector<80x16xf32> -> vector<80x16xf32>
    %34 = arith.addf %28, %33 : vector<80x16xf32>
    %c0_33 = arith.constant 0 : index
    %c300 = arith.constant 300 : index
    %c0_34 = arith.constant 0 : index
    %35 = vector.load %arg1[%c0_33, %c300, %c0_34] : memref<1x400x8xbf16, #tpu.memory_space<vmem>>, vector<1x80x8xbf16>
    %36 = vector.shape_cast %35 : vector<1x80x8xbf16> to vector<80x8xbf16>
    %c4 = arith.constant 4 : index
    %c0_35 = arith.constant 0 : index
    %c0_36 = arith.constant 0 : index
    %37 = vector.load %arg2[%c4, %c0_35, %c0_36] : memref<9x8x16xbf16, #tpu.memory_space<vmem>>, vector<1x8x16xbf16>
    %38 = vector.shape_cast %37 : vector<1x8x16xbf16> to vector<8x16xbf16>
    %cst_37 = arith.constant dense<0.000000e+00> : vector<80x16xf32>
    %39 = tpu.matmul %36, %38, %cst_37 {dimension_numbers = #tpu.dot_dimension_numbers<[1], [0], [0], [1], [0, 0, 1, 1], [], []>} : vector<80x8xbf16>, vector<8x16xbf16>, vector<80x16xf32> -> vector<80x16xf32>
    %40 = arith.addf %34, %39 : vector<80x16xf32>
    %c0_38 = arith.constant 0 : index
    %c201 = arith.constant 201 : index
    %c0_39 = arith.constant 0 : index
    %41 = vector.load %arg1[%c0_38, %c201, %c0_39] : memref<1x400x8xbf16, #tpu.memory_space<vmem>>, vector<1x80x8xbf16>
    %42 = vector.shape_cast %41 : vector<1x80x8xbf16> to vector<80x8xbf16>
    %c5 = arith.constant 5 : index
    %c0_40 = arith.constant 0 : index
    %c0_41 = arith.constant 0 : index
    %43 = vector.load %arg2[%c5, %c0_40, %c0_41] : memref<9x8x16xbf16, #tpu.memory_space<vmem>>, vector<1x8x16xbf16>
    %44 = vector.shape_cast %43 : vector<1x8x16xbf16> to vector<8x16xbf16>
    %cst_42 = arith.constant dense<0.000000e+00> : vector<80x16xf32>
    %45 = tpu.matmul %42, %44, %cst_42 {dimension_numbers = #tpu.dot_dimension_numbers<[1], [0], [0], [1], [0, 0, 1, 1], [], []>} : vector<80x8xbf16>, vector<8x16xbf16>, vector<80x16xf32> -> vector<80x16xf32>
    %46 = arith.addf %40, %45 : vector<80x16xf32>
    %c0_43 = arith.constant 0 : index
    %c10 = arith.constant 10 : index
    %c0_44 = arith.constant 0 : index
    %47 = vector.load %arg1[%c0_43, %c10, %c0_44] : memref<1x400x8xbf16, #tpu.memory_space<vmem>>, vector<1x80x8xbf16>
    %48 = vector.shape_cast %47 : vector<1x80x8xbf16> to vector<80x8xbf16>
    %c6 = arith.constant 6 : index
    %c0_45 = arith.constant 0 : index
    %c0_46 = arith.constant 0 : index
    %49 = vector.load %arg2[%c6, %c0_45, %c0_46] : memref<9x8x16xbf16, #tpu.memory_space<vmem>>, vector<1x8x16xbf16>
    %50 = vector.shape_cast %49 : vector<1x8x16xbf16> to vector<8x16xbf16>
    %cst_47 = arith.constant dense<0.000000e+00> : vector<80x16xf32>
    %51 = tpu.matmul %48, %50, %cst_47 {dimension_numbers = #tpu.dot_dimension_numbers<[1], [0], [0], [1], [0, 0, 1, 1], [], []>} : vector<80x8xbf16>, vector<8x16xbf16>, vector<80x16xf32> -> vector<80x16xf32>
    %52 = arith.addf %46, %51 : vector<80x16xf32>
    %c0_48 = arith.constant 0 : index
    %c110 = arith.constant 110 : index
    %c0_49 = arith.constant 0 : index
    %53 = vector.load %arg1[%c0_48, %c110, %c0_49] : memref<1x400x8xbf16, #tpu.memory_space<vmem>>, vector<1x80x8xbf16>
    %54 = vector.shape_cast %53 : vector<1x80x8xbf16> to vector<80x8xbf16>
    %c7 = arith.constant 7 : index
    %c0_50 = arith.constant 0 : index
    %c0_51 = arith.constant 0 : index
    %55 = vector.load %arg2[%c7, %c0_50, %c0_51] : memref<9x8x16xbf16, #tpu.memory_space<vmem>>, vector<1x8x16xbf16>
    %56 = vector.shape_cast %55 : vector<1x8x16xbf16> to vector<8x16xbf16>
    %cst_52 = arith.constant dense<0.000000e+00> : vector<80x16xf32>
    %57 = tpu.matmul %54, %56, %cst_52 {dimension_numbers = #tpu.dot_dimension_numbers<[1], [0], [0], [1], [0, 0, 1, 1], [], []>} : vector<80x8xbf16>, vector<8x16xbf16>, vector<80x16xf32> -> vector<80x16xf32>
    %58 = arith.addf %52, %57 : vector<80x16xf32>
    %c0_53 = arith.constant 0 : index
    %c11 = arith.constant 11 : index
    %c0_54 = arith.constant 0 : index
    %59 = vector.load %arg1[%c0_53, %c11, %c0_54] : memref<1x400x8xbf16, #tpu.memory_space<vmem>>, vector<1x80x8xbf16>
    %60 = vector.shape_cast %59 : vector<1x80x8xbf16> to vector<80x8xbf16>
    %c8 = arith.constant 8 : index
    %c0_55 = arith.constant 0 : index
    %c0_56 = arith.constant 0 : index
    %61 = vector.load %arg2[%c8, %c0_55, %c0_56] : memref<9x8x16xbf16, #tpu.memory_space<vmem>>, vector<1x8x16xbf16>
    %62 = vector.shape_cast %61 : vector<1x8x16xbf16> to vector<8x16xbf16>
    %cst_57 = arith.constant dense<0.000000e+00> : vector<80x16xf32>
    %63 = tpu.matmul %60, %62, %cst_57 {dimension_numbers = #tpu.dot_dimension_numbers<[1], [0], [0], [1], [0, 0, 1, 1], [], []>} : vector<80x8xbf16>, vector<8x16xbf16>, vector<80x16xf32> -> vector<80x16xf32>
    %64 = arith.addf %58, %63 : vector<80x16xf32>
    %65 = tpu.iota {dimensions = array<i32: 0>} : vector<80x1xi32>
    %c0_i32 = arith.constant 0 : i32
    %66 = vector.broadcast %c0_i32 : i32 to vector<80x1xi32>
    %67 = arith.addi %65, %66 : vector<80x1xi32>
    %c10_i32 = arith.constant 10 : i32
    %c0_i32_58 = arith.constant 0 : i32
    %68 = arith.cmpi eq, %c10_i32, %c0_i32_58 : i32
    %c1_i32 = arith.constant 1 : i32
    %69 = arith.select %68, %c1_i32, %c10_i32 : i32
    %70 = vector.broadcast %69 : i32 to vector<80x1xi32>
    %71 = arith.remsi %67, %70 : vector<80x1xi32>
    %c0_i32_59 = arith.constant 0 : i32
    %72 = vector.broadcast %c0_i32_59 : i32 to vector<80x1xi32>
    %73 = arith.cmpi ne, %71, %72 : vector<80x1xi32>
    %c0_i32_60 = arith.constant 0 : i32
    %74 = vector.broadcast %c0_i32_60 : i32 to vector<80x1xi32>
    %75 = arith.cmpi slt, %71, %74 : vector<80x1xi32>
    %c0_i32_61 = arith.constant 0 : i32
    %76 = arith.cmpi slt, %69, %c0_i32_61 : i32
    %77 = vector.broadcast %76 : i1 to vector<80x1xi1>
    %78 = vector.broadcast %77 : vector<80x1xi1> to vector<80x1xi1>
    %79 = arith.xori %75, %78 : vector<80x1xi1>
    %80 = arith.andi %79, %73 : vector<80x1xi1>
    %81 = vector.broadcast %69 : i32 to vector<80x1xi32>
    %82 = arith.addi %71, %81 : vector<80x1xi32>
    %83 = arith.select %80, %82, %71 : vector<80x1xi1>, vector<80x1xi32>
    %84 = vector.broadcast %8 : vector<1x16xf32> to vector<80x16xf32>
    %85 = arith.mulf %64, %84 : vector<80x16xf32>
    %86 = vector.broadcast %9 : vector<1x16xf32> to vector<80x16xf32>
    %87 = arith.addf %85, %86 : vector<80x16xf32>
    %cst_62 = arith.constant 0.000000e+00 : f32
    %88 = vector.broadcast %cst_62 : f32 to vector<80x16xf32>
    %89 = arith.maximumf %87, %88 : vector<80x16xf32>
    %c8_i32 = arith.constant 8 : i32
    %90 = vector.broadcast %c8_i32 : i32 to vector<80x1xi32>
    %91 = arith.cmpi slt, %83, %90 : vector<80x1xi32>
    %cst_63 = arith.constant 0.000000e+00 : f32
    %92 = vector.shape_cast %91 : vector<80x1xi1> to vector<80x1xi1>
    %93 = vector.broadcast %92 : vector<80x1xi1> to vector<80x16xi1>
    %94 = vector.broadcast %cst_63 : f32 to vector<80x16xf32>
    %95 = arith.select %93, %89, %94 : vector<80x16xi1>, vector<80x16xf32>
    %96 = arith.truncf %95 : vector<80x16xf32> to vector<80x16xbf16>
    %c0_64 = arith.constant 0 : index
    %c11_65 = arith.constant 11 : index
    %c0_66 = arith.constant 0 : index
    %97 = vector.load %arg6[%c0_64, %c11_65, %c0_66] : memref<1x110x16xbf16, #tpu.memory_space<vmem>>, vector<1x80x16xbf16>
    %98 = vector.shape_cast %97 : vector<1x80x16xbf16> to vector<80x16xbf16>
    %99 = vector.shape_cast %96 : vector<80x16xbf16> to vector<1x80x16xbf16>
    tpu.vector_store %arg6[%c0_64, %c11_65, %c0_66], %99 {strides = array<i32>} : memref<1x110x16xbf16, #tpu.memory_space<vmem>>, vector<1x80x16xbf16>,
    %c0_67 = arith.constant 0 : index
    %c300_68 = arith.constant 300 : index
    %c0_69 = arith.constant 0 : index
    %100 = vector.load %arg1[%c0_67, %c300_68, %c0_69] : memref<1x400x8xbf16, #tpu.memory_space<vmem>>, vector<1x80x8xbf16>
    %101 = vector.shape_cast %100 : vector<1x80x8xbf16> to vector<80x8xbf16>
    %c0_70 = arith.constant 0 : index
    %c0_71 = arith.constant 0 : index
    %102 = vector.load %arg5[%c0_70, %c0_71] : memref<8x16xbf16, #tpu.memory_space<vmem>>, vector<8x16xbf16>
    %cst_72 = arith.constant dense<0.000000e+00> : vector<80x16xf32>
    %103 = tpu.matmul %101, %102, %cst_72 {dimension_numbers = #tpu.dot_dimension_numbers<[1], [0], [0], [1], [0, 0, 1, 1], [], []>} : vector<80x8xbf16>, vector<8x16xbf16>, vector<80x16xf32> -> vector<80x16xf32>
    %104 = arith.truncf %103 : vector<80x16xf32> to vector<80x16xbf16>
    %c0_73 = arith.constant 0 : index
    %c0_74 = arith.constant 0 : index
    %c0_75 = arith.constant 0 : index
    %105 = vector.load %arg7[%c0_73, %c0_74, %c0_75] : memref<1x80x16xbf16, #tpu.memory_space<vmem>>, vector<1x80x16xbf16>
    %106 = vector.shape_cast %105 : vector<1x80x16xbf16> to vector<80x16xbf16>
    %107 = vector.shape_cast %104 : vector<80x16xbf16> to vector<1x80x16xbf16>
    tpu.vector_store %arg7[%c0_73, %c0_74, %c0_75], %107 {strides = array<i32>} : memref<1x80x16xbf16, #tpu.memory_space<vmem>>, vector<1x80x16xbf16>,
    return
  }
  func.func @transform_0(%arg0: i32) -> (i32, i32, i32) {
    %c0_i32 = arith.constant 0 : i32
    %c0_i32_0 = arith.constant 0 : i32
    %c0_i32_1 = arith.constant 0 : i32
    return %arg0, %c0_i32, %c0_i32_0 : i32, i32, i32
  }
  func.func @transform_1(%arg0: i32) -> (i32, i32, i32) {
    %c0_i32 = arith.constant 0 : i32
    %c0_i32_0 = arith.constant 0 : i32
    %c0_i32_1 = arith.constant 0 : i32
    %c0_i32_2 = arith.constant 0 : i32
    return %c0_i32, %c0_i32_0, %c0_i32_1 : i32, i32, i32
  }
  func.func @transform_2(%arg0: i32) -> (i32, i32) {
    %c0_i32 = arith.constant 0 : i32
    %c0_i32_0 = arith.constant 0 : i32
    %c0_i32_1 = arith.constant 0 : i32
    return %c0_i32, %c0_i32_0 : i32, i32
  }
  func.func @transform_3(%arg0: i32) -> (i32, i32) {
    %c0_i32 = arith.constant 0 : i32
    %c0_i32_0 = arith.constant 0 : i32
    %c0_i32_1 = arith.constant 0 : i32
    return %c0_i32, %c0_i32_0 : i32, i32
  }
  func.func @transform_4(%arg0: i32) -> (i32, i32) {
    %c0_i32 = arith.constant 0 : i32
    %c0_i32_0 = arith.constant 0 : i32
    %c0_i32_1 = arith.constant 0 : i32
    return %c0_i32, %c0_i32_0 : i32, i32
  }
  func.func @transform_5(%arg0: i32) -> (i32, i32, i32) {
    %c0_i32 = arith.constant 0 : i32
    %c0_i32_0 = arith.constant 0 : i32
    %c0_i32_1 = arith.constant 0 : i32
    return %arg0, %c0_i32, %c0_i32_0 : i32, i32, i32
  }
  func.func @transform_6(%arg0: i32) -> (i32, i32, i32) {
    %c0_i32 = arith.constant 0 : i32
    %c0_i32_0 = arith.constant 0 : i32
    %c0_i32_1 = arith.constant 0 : i32
    return %arg0, %c0_i32, %c0_i32_0 : i32, i32, i32
  }
}

</mosaic_0001>

<bundles_post_ra>
// kernel: tpu_custom_call.1
= control target key start
LH: loop header
LB: loop body
LE: loop exit
PB: predicated region body
PF: predicated region fallthrough
CT: control target
= control target key end

     0   :  { %s3107_s21 = smov 0   ;;  %s3902_s0 = inlined_call_operand.vmem [shape: bf16[2,400,8], index: 0, kind: input, shape index: {}]   ;;  %s3903_s1 = inlined_call_operand.vmem [shape: bf16[9,8,16], index: 1, kind: input, shape index: {}]   ;;  %s3904_s2 = inlined_call_operand.vmem [shape: f32[1,16], index: 2, kind: input, shape index: {}]   ;;  %s3905_s3 = inlined_call_operand.vmem [shape: f32[1,16], index: 3, kind: input, shape index: {}]   ;;  %s3906_s4 = inlined_call_operand.vmem [shape: bf16[8,16], index: 4, kind: input, shape index: {}]   ;;  %s3907_s5 = inlined_call_operand.vmem [shape: bf16[2,110,16], index: 5, kind: output, shape index: {0}]   ;;  %s3908_s6 = inlined_call_operand.vmem [shape: bf16[2,80,16], index: 6, kind: output, shape index: {1}]  }
   0x1 LB: > { %s2381_s22 = sadd.s32 4294967295, %s3067_s21   ;;  %p2385_p0 = scmp.ge.s32.totalorder %s3067_s21, 1  ;;  %s3067_s21 = sphi %s3107_s21, %s17_s21  }
   0x2   : > { %p215_p1 = scmp.lt.s32.totalorder %s3067_s21, 3 }
   0x4   : > { %p216_p2 = pnand %p2385_p0, %p215_p1 }
   0x5   : > { %vm365_vm0 = vcmask (!%p216_p2), 1043456   ;;  %v2434_v0 = vld [vmem:[%s3903_s1 + $0x10] sm:$0xf] (!%p216_p2)  ;;  %v2389_v1 = vld [vmem:[%s3903_s1 + $0x4] sm:$0xf] (!%p216_p2)  ;;  %v3069_v2 = vmov (!%p216_p2), 0.0  }
   0x6   : > { %219 = sbr.rel (%p216_p2) target bundleno = 451 (0x1c3), region = 40  ;;  %2692 = vmatprep.subr.bf16.mxu0 (!%p216_p2), %v3069_v2  ;;  %2604 = vmatprep.subr.bf16.mxu1 (!%p216_p2), %v3069_v2  ;;  %v951_v3 = vsel (!%p216_p2), %vm365_vm0, %v2434_v0, 0  ;;  %v367_v4 = vsel (!%p216_p2), %vm365_vm0, %v2389_v1, 0  ;;  %p250_p3 = scmp.lt.s32.totalorder (!%p216_p2), %s2381_s22, 1  ;;  %vm3070_vm1 = vmmov (!%p216_p2), 0   ;;  %vm337_vm2 = vcmask (!%p216_p2), 1045504  }
   0x7   : > { %2693 = vmatpush3.bf16.msra.mxu0 (!%p216_p2), %v951_v3  ;;  %2605 = vmatpush3.bf16.msra.mxu1 (!%p216_p2), %v367_v4  ;;  %v295_v5 = vld [vmem:[%s3903_s1] sm:$0xf] (!%p216_p2)  ;;  %vm349_vm3 = vcmask (!%p216_p2), 64512   ;;  %v2446_v8 = vld [vmem:[%s3903_s1 + $0x14] sm:$0xf] (!%p216_p2)  ;;  %vm1263_vm6 = vcmask (!%p216_p2), 1046528  }
   0x8   : > { %2606 = vmatprep.mubr.msk.bf16.mxu1 (!%p216_p2), %vm3070_vm1, %v3069_v2  ;;  %2694 = vmatprep.mubr.msk.bf16.mxu0 (!%p216_p2), %vm3070_vm1, %v3069_v2  ;;  %v483_v13 = vsel (!%p216_p2), %vm365_vm0, %v295_v5, 0  ;;  %v1137_v19 = vsel (!%p216_p2), %vm365_vm0, %v2446_v8, 0  ;;  %v2411_v49 = vld [vmem:[%s3903_s1 + $0x8] sm:$0xf] (!%p216_p2)  ;;  %vm599_vm4 = vsmask.f32 (!%p216_p2), 7424 }
   0x9   : > { %2714 = vmatprep.subr.bf16.mxu0 (!%p216_p2), %v3069_v2  ;;  %2626 = vmatprep.subr.bf16.mxu1 (!%p216_p2), %v3069_v2  ;;  %v2458_v54 = vld [vmem:[%s3903_s1 + $0x18] sm:$0xf] (!%p216_p2)  ;;  %v660_v55 = vsel (!%p216_p2), %vm365_vm0, %v2411_v49, 0  ;;  %vm1536_vm5 = vsmask.f32 (!%p216_p2), 6400  ;;  %vm1417_vm7 = vcmask (!%p216_p2), 1044480  }
   0xa   : > { %v1291_v61 = vsel (!%p216_p2), %vm365_vm0, %v2458_v54, 0  ;;  %vm268_vm8 = vcmask (!%p216_p2), 123904   ;;  %vm269_vm9 = vsmask.f32 (!%p216_p2), 1280  ;;  %vm274_vm10 = vcmask (!%p216_p2), 125953  }
   0xb   : > { %vm3463_vm11 = vmand (!%p216_p2), %vm268_vm8, %vm269_vm9  ;;  %vm275_vm12 = vsmask.f32 (!%p216_p2), 7942  ;;  %vm281_vm13 = vcmask (!%p216_p2), 124928   ;;  %vm266_vm15 = vcmask (!%p216_p2), 125952  }
   0xc   : > { %vm3473_vm14 = vmand (!%p216_p2), %vm274_vm10, %vm275_vm12 }
   0xd   : > { %s3952_s22 = smov (!%p250_p3, %s2381_s22), 1 }
   0xe   : > { %s2974_s27 = smul.u32 200, %s3952_s22 }
   0xf   : > { %s2975_s25 = smul.u32 56, %s3952_s22 }
  0x10   : > { %s3137_s30 = scalar_lea.vmem %s3902_s0, %s2974_s27  ;;  %s2976_s29 = smul.u32 40, %s3952_s22 }
  0x11   : > { %v3008_v6 = vld [vmem:[%s3137_s30 + $0x30] sm:$0xfc]   ;;  %v3009_v7 = vld [vmem:[%s3137_s30 + $0x38] sm:$0xff]   ;;  %v3012_v16 = vld [vmem:[%s3137_s30 + $0x40] sm:$0xff]   ;;  %s3470_s28 = scalar_lea.vmem %s3907_s5, %s2975_s25 }
  0x12   : > { %v338_v9 = vrot.slane %v3008_v6, 2  ;;  %v339_v10 = vrot.slane %v3009_v7, 2  ;;  %v3010_v11 = vld [vmem:[%s3137_s30 + $0x94] sm:$0xfc]   ;;  %v3011_v12 = vld [vmem:[%s3137_s30 + $0x9c] sm:$0xff]   ;;  %v3013_v18 = vld [vmem:[%s3137_s30 + $0xa4] sm:$0xff]   ;;  %s3585_s7 = scalar_lea.vmem %s3908_s6, %s2976_s29 }
  0x13   : > { %v924_v15 = vrot.slane %v3010_v11, 2  ;;  %v925_v17 = vrot.slane %v3011_v12, 2  ;;  %v341_v20 = vrot.slane %v3012_v16, 2  ;;  %v927_v22 = vrot.slane %v3013_v18, 2  ;;  %v3014_v24 = vld [vmem:[%s3137_s30 + $0x48] sm:$0xff]   ;;  %v3016_v30 = vld [vmem:[%s3137_s30 + $0x50] sm:$0xff]  }
  0x14   : > { %v340_v14 = vsel %vm337_vm2, %v338_v9, %v339_v10  ;;  %v3015_v26 = vld [vmem:[%s3137_s30 + $0xac] sm:$0xff]   ;;  %v343_v27 = vrot.slane %v3014_v24, 2  ;;  %v3017_v32 = vld [vmem:[%s3137_s30 + $0xb4] sm:$0xff]   ;;  %v345_v33 = vrot.slane %v3016_v30, 2  ;;  %v3021_v39 = vld [vmem:[%s3137_s30 + $0x64] sm:$0xff]  }
  0x15   : > { %2607 = vmatmul.mubr.msk.bf16.vlgmr.msra.gmra.mrb[0].mxu1 %vm349_vm3, %v340_v14  ;;  %v926_v21 = vsel %vm337_vm2, %v924_v15, %v925_v17  ;;  %v342_v23 = vsel %vm337_vm2, %v339_v10, %v341_v20  ;;  %v928_v25 = vsel %vm337_vm2, %v925_v17, %v927_v22  ;;  %v929_v28 = vrot.slane %v3015_v26, 2  ;;  %v3018_v36 = vld [vmem:[%s3137_s30 + $0x58] ss:$0 sps:$4 sm:$0x33]   ;;  %v3022_v42 = vld [vmem:[%s3137_s30 + $0x6c] sm:$0xff]   ;;  %v3020_v51 = vld [vmem:[%s3137_s30] sm:$0xff]  }
  0x16   : > { %2610 = vmatprep.mubr.msk.bf16.mxu1 %vm3070_vm1, %v3069_v2  ;;  %2627 = vmatpush3.bf16.msra.mxu1 %v483_v13  ;;  %v344_v29 = vsel %vm337_vm2, %v341_v20, %v343_v27  ;;  %v931_v34 = vrot.slane %v3017_v32, 2  ;;  %v346_v35 = vsel %vm337_vm2, %v343_v27, %v345_v33  ;;  %v3019_v37 = vld [vmem:[%s3137_s30 + $0xbc] ss:$0 sps:$4 sm:$0x33]   ;;  %v347_v40 = vrot.slane %v3018_v36, 2  ;;  %v3024_v50 = vld [vmem:[%s3137_s30 + $0x74] sm:$0xff]  }
  0x17   : > { %2648 = vmatprep.subr.bf16.mxu1 %v3069_v2  ;;  %2695 = vmatmul.mubr.msk.bf16.vlgmr.msra.gmra.mrb[0].mxu0 %vm349_vm3, %v926_v21  ;;  %v930_v31 = vsel %vm337_vm2, %v927_v22, %v929_v28  ;;  %v933_v41 = vrot.slane %v3019_v37, 2  ;;  %v1080_v43 = vshll.u32 %v3021_v39, 16  ;;  %v1078_v46 = vshrl.u32 %v3021_v39, 16  ;;  %v3213_v56 = vld [vmem:[%s3137_s30 + $0x4] sm:$0xfe]   ;;  %v3222_v62 = vld [vmem:[%s3137_s30 + $0x7c] sm:$0xff]  }
  0x18   : > { %2715 = vmatpush3.bf16.msra.mxu0 %v1137_v19  ;;  %2698 = vmatprep.mubr.msk.bf16.mxu0 %vm3070_vm1, %v3069_v2  ;;  %v932_v38 = vsel %vm337_vm2, %v929_v28, %v931_v34  ;;  %v348_v44 = vsel %vm337_vm2, %v345_v33, %v347_v40  ;;  %v1085_v48 = vshll.u32 %v3022_v42, 16  ;;  %v1089_v57 = vshrl.u32 %v3022_v42, 16  ;;  %v3225_v63 = vld [vmem:[%s3137_s30 + $0xc] sm:$0xff]   ;;  %v3230_v3 = vld [vmem:[%s3137_s30 + $0x14] sm:$0xff]   ;;  %v3236_v5 = vld [vmem:[%s3137_s30 + $0x1c] sm:$0xff]  }
  0x19   : > { %2736 = vmatprep.subr.bf16.mxu0 %v3069_v2  ;;  %v934_v45 = vsel %vm337_vm2, %v931_v34, %v933_v41  ;;  %v1082_v47 = vrot.slane %v1080_v43, 1  ;;  %v1093_v58 = vshll.u32 %v3024_v50, 16  ;;  %v1538_v60 = vshrl.u32 %v3213_v56, 16  ;;  %v3023_v4 = vld [vmem:[%s3137_s30 + $0x8] sm:$0xff]   ;;  %v3031_v49 = vld [vmem:[%s3137_s30] sm:$0xff]  }
  0x1a   : > { %v1087_v53 = vrot.slane %v1085_v48, 1  ;;  %v1541_v7 = vshll.u32 %v3213_v56, 16  ;;  %v1546_v8 = vshrl.u32 %v3225_v63, 16  ;;  %v1097_v9 = vshrl.u32 %v3024_v50, 16  ;;  %v3252_v26 = vld [vmem:[%s3137_s30 + $0x24] sm:$0xff]  }
  0x1b   : > { %v1083_v52 = vor.u32 %v1082_v47, %v1078_v46  ;;  %v1095_v1 = vrot.slane %v1093_v58, 1  ;;  %v1540_v6 = vrot.slane %v1538_v60, 1  ;;  %v1549_v10 = vshll.u32 %v3225_v63, 16  ;;  %v3028_v33 = vld [vmem:[%s3137_s30 + $0x84] sm:$0xff]  }
  0x1c   : > { %v1091_v0 = vor.u32 %v1089_v57, %v1087_v53  ;;  %v1555_v11 = vshrl.u32 %v3230_v3, 16  ;;  %v1558_v12 = vshll.u32 %v3230_v3, 16  ;;  %v1101_v13 = vshll.u32 %v3222_v62, 16  ;;  %v3030_v48 = vld [vmem:[%s3137_s30 + $0x8c] ss:$0 sps:$4 sm:$0x11]  }
  0x1d   : > { %2611 = vmatmul.mubr.msk.bf16.gmra.mrb[4].mxu1 %vm349_vm3, %v342_v23  ;;  %v1088_v59 = vsel %vm599_vm4, %v1083_v52, %v1087_v53  ;;  %v1543_v14 = vrot.slane %v1541_v7, 2  ;;  %v1548_v15 = vrot.slane %v1546_v8, 1  ;;  %v1564_v16 = vshrl.u32 %v3236_v5, 16  ;;  %v3032_v53 = vld [vmem:[%s3137_s30 + $0x8] sm:$0xff]  }
  0x1e   : > { %2614 = vmatprep.mubr.msk.bf16.mxu1 %vm3070_vm1, %v3069_v2  ;;  %v1096_v17 = vsel %vm599_vm4, %v1091_v0, %v1095_v1  ;;  %v1551_v18 = vrot.slane %v1549_v10, 2  ;;  %v1557_v19 = vrot.slane %v1555_v11, 1  ;;  %v1560_v20 = vrot.slane %v1558_v12, 2  ;;  %v2470_v12 = vld [vmem:[%s3903_s1 + $0x1c] sm:$0xf] }
  0x1f   : > { %2699 = vmatmul.mubr.msk.bf16.gmra.mrb[4].mxu0 %vm349_vm3, %v928_v25  ;;  %v1544_v21 = vor.u32 %v1543_v14, %v1540_v6  ;;  %v1566_v22 = vrot.slane %v1564_v16, 1  ;;  %v1567_v23 = vshll.u32 %v3236_v5, 16  ;;  %v1099_v28 = vor.u32 %v1097_v9, %v1095_v1  ;;  %v2423_v6 = vld [vmem:[%s3903_s1 + $0xc] sm:$0xf]  ;;  %v3037_v16 = vld [vmem:[%s3137_s30 + $0x18] sm:$0xff]  }
  0x20   : > { %2702 = vmatprep.mubr.msk.bf16.mxu0 %vm3070_vm1, %v3069_v2  ;;  %v1552_v24 = vor.u32 %v1551_v18, %v1548_v15  ;;  %v1561_v25 = vor.u32 %v1560_v20, %v1557_v19  ;;  %v1103_v32 = vrot.slane %v1101_v13, 1  ;;  %v1576_v36 = vshll.u32 %v3252_v26, 16 }
  0x21   : > { %v1569_v27 = vrot.slane %v1567_v23, 2  ;;  %v1105_v41 = vshrl.u32 %v3222_v62, 16  ;;  %v1109_v42 = vshll.u32 %v3028_v33, 16  ;;  %v1117_v52 = vshll.u32 %v3030_v48, 16  ;;  %v3045_v48 = vld [vmem:[%s3137_s30 + $0x3c] sm:$0xff]  }
  0x22   : > { %v3259_v30 = vsel %vm1536_vm5, %v1552_v24, %v1561_v25  ;;  %v1578_v39 = vrot.slane %v1576_v36, 2  ;;  %v1104_v40 = vsel %vm599_vm4, %v1099_v28, %v1103_v32  ;;  %v603_v54 = vshll.u32 %v3031_v49, 16 }
  0x23   : > { %v1570_v34 = vor.u32 %v1569_v27, %v1566_v22  ;;  %v1107_v46 = vor.u32 %v1105_v41, %v1103_v32  ;;  %v1111_v47 = vrot.slane %v1109_v42, 1  ;;  %v1119_v58 = vrot.slane %v1117_v52, 1 }
  0x24   : > { %v605_v60 = vrot.slane %v603_v54, 1  ;;  %v1264_v7 = vrot.slane %v3213_v56, 1  ;;  %v1265_v8 = vrot.slane %v3225_v63, 1  ;;  %v612_v10 = vshrl.u32 %v3032_v53, 16 }
  0x25   : > { %2615 = vmatmul.mubr.msk.bf16.gmra.mrb[8].mxu1 %vm349_vm3, %v344_v29  ;;  %v3256_v29 = vsel %vm1536_vm5, %v1544_v21, %v1552_v24  ;;  %v3268_v37 = vsel %vm1536_vm5, %v1561_v25, %v1570_v34  ;;  %v1112_v50 = vsel %vm599_vm4, %v1107_v46, %v1111_v47  ;;  %v798_v13 = vsel %vm365_vm0, %v2423_v6, 0  ;;  %v3039_v24 = vld [vmem:[%s3137_s30 + $0x20] sm:$0xff]   ;;  %v3051_v6 = vld [vmem:[%s3137_s30 + $0x54] sm:$0xff]  }
  0x26   : > { %2618 = vmatprep.mubr.msk.bf16.mxu1 %vm3070_vm1, %v3069_v2  ;;  %v1266_v14 = vsel %vm1263_vm6, %v1264_v7, %v1265_v8  ;;  %v1445_v15 = vsel %vm365_vm0, %v2470_v12, 0  ;;  %v624_v20 = vshll.u32 %v3037_v16, 16  ;;  %v628_v27 = vshrl.u32 %v3037_v16, 16  ;;  %v3050_v7 = vld [vmem:[%s3137_s30 + $0x7c] sm:$0xff]  }
  0x27   : > { %2703 = vmatmul.mubr.msk.bf16.gmra.mrb[8].mxu0 %vm349_vm3, %v930_v31  ;;  %v3025_v31 = vld [vmem:[%s3137_s30 + $0x10] sm:$0xff]   ;;  %v632_v28 = vshll.u32 %v3039_v24, 16  ;;  %v636_v36 = vshrl.u32 %v3039_v24, 16  ;;  %v1419_v52 = vrot.slane %v3045_v48, 3 }
  0x28   : > { %2706 = vmatprep.mubr.msk.bf16.mxu0 %vm3070_vm1, %v3069_v2  ;;  %v626_v23 = vrot.slane %v624_v20, 1  ;;  %v3057_v20 = vld [vmem:[%s3137_s30 + $0xac] sm:$0xff]  }
  0x2a   : > { %v630_v32 = vor.u32 %v628_v27, %v626_v23  ;;  %v3060_v27 = vld [vmem:[%s3137_s30 + $0xbc] ss:$0 sps:$4 sm:$0x33]  }
  0x2d   : > { %2619 = vmatmul.mubr.msk.bf16.gmra.mrb[12].mxu1 %vm349_vm3, %v346_v35  ;;  %v1573_v35 = vshrl.u32 %v3252_v26, 16 }
  0x2e   : > { %2622 = vmatprep.mubr.msk.bf16.mxu1 %vm3070_vm1, %v3069_v2 }
  0x2f   : > { %2707 = vmatmul.mubr.msk.bf16.gmra.mrb[12].mxu0 %vm349_vm3, %v932_v38  ;;  %v1575_v38 = vrot.slane %v1573_v35, 1 }
  0x30   : > { %2710 = vmatprep.mubr.msk.bf16.mxu0 %vm3070_vm1, %v3069_v2 }
  0x31   : > { %v3273_v43 = vor.u32 %v1578_v39, %v1575_v38 }
  0x35   : > { %2623 = vmatmul.mubr.msk.bf16.gmra.mrb[16].mxu1 %vm349_vm3, %v348_v44  ;;  %v3279_v44 = vsel %vm1536_vm5, %v1570_v34, %v3273_v43  ;;  %v3041_v34 = vld [vmem:[%s3137_s30 + $0x28] ss:$0 sps:$4 sm:$0x11]  }
  0x36   : > { %2628 = vmatprep.mubr.msk.bf16.mxu1 %vm3070_vm1, %v3069_v2  ;;  %v640_v38 = vshll.u32 %v3041_v34, 16 }
  0x37   : > { %2711 = vmatmul.mubr.msk.bf16.gmra.mrb[16].mxu0 %vm349_vm3, %v934_v45  ;;  %v3027_v45 = vld [vmem:[%s3137_s30 + $0x18] sm:$0xff]  }
  0x38   : > { %2716 = vmatprep.mubr.msk.bf16.mxu0 %vm3070_vm1, %v3069_v2  ;;  %v642_v42 = vrot.slane %v640_v38, 1 }
  0x3d   : > { %2629 = vmatmul.mubr.msk.bf16.vlgmr.msra.gmra.mrb[0].mxu1 %vm349_vm3, %v3020_v51  ;;  %v1113_v51 = vshrl.u32 %v3028_v33, 16  ;;  %v634_v33 = vrot.slane %v632_v28, 1 }
  0x3e   : > { %2632 = vmatprep.mubr.msk.bf16.mxu1 %vm3070_vm1, %v3069_v2  ;;  %2649 = vmatpush3.bf16.msra.mxu1 %v660_v55  ;;  %v3029_v55 = vld [vmem:[%s3137_s30 + $0x20] sm:$0xff]  }
  0x3f   : > { %2670 = vmatprep.subr.bf16.mxu1 %v3069_v2  ;;  %2717 = vmatmul.mubr.msk.bf16.vlgmr.msra.gmra.mrb[0].mxu0 %vm349_vm3, %v1088_v59  ;;  %v1115_v57 = vor.u32 %v1113_v51, %v1111_v47  ;;  %v601_v59 = vshrl.u32 %v3031_v49, 16  ;;  %v635_v35 = vsel %vm599_vm4, %v630_v32, %v634_v33  ;;  %v638_v41 = vor.u32 %v636_v36, %v634_v33  ;;  %v3044_v47 = vld [vmem:[%s3137_s30 + $0x34] sm:$0xf8]   ;;  %v2112_v49 = vld [vmem:[%s3906_s4] sm:$0xf] }
  0x40   : > { %2737 = vmatpush3.bf16.msra.mxu0 %v1291_v61  ;;  %2720 = vmatprep.mubr.msk.bf16.mxu0 %vm3070_vm1, %v3069_v2  ;;  %v608_v61 = vshll.u32 %v3032_v53, 16  ;;  %v1418_v51 = vrot.slane %v3044_v47, 3  ;;  %v2482_v53 = vld [vmem:[%s3903_s1 + $0x20] sm:$0xf]  ;;  %v2168_v54 = vsel %vm365_vm0, %v2112_v49, 0  ;;  %v2150_v32 = vrot.slane %v3060_v27, 2 }
  0x41   : > { %2758 = vmatprep.subr.bf16.mxu0 %v3069_v2  ;;  %v1120_v62 = vsel %vm599_vm4, %v1115_v57, %v1119_v58  ;;  %v606_v0 = vor.u32 %v605_v60, %v601_v59  ;;  %v3047_v57 = vld [vmem:[%s3137_s30 + $0x44] sm:$0xff]   ;;  %v1606_v58 = vsel %vm365_vm0, %v2482_v53, 0  ;;  %v3046_v59 = vld [vmem:[%s3137_s30 + $0x6c] sm:$0xff]  }
  0x42   : > { %v610_v1 = vrot.slane %v608_v61, 1  ;;  %v1421_v60 = vrot.slane %v3047_v57, 3 }
  0x44   : > { %v611_v9 = vsel %vm599_vm4, %v606_v0, %v610_v1  ;;  %v614_v56 = vor.u32 %v612_v10, %v610_v1  ;;  %v1422_v61 = vsel %vm1417_vm7, %v1419_v52, %v1421_v60  ;;  %v3048_v0 = vld [vmem:[%s3137_s30 + $0x74] sm:$0xff]   ;;  %v3053_v10 = vld [vmem:[%s3137_s30 + $0x5c] ss:$0 sps:$4 sm:$0x77]  }
  0x45   : > { %2633 = vmatmul.mubr.msk.bf16.gmra.mrb[4].mxu1 %vm349_vm3, %v3023_v4  ;;  %v3035_v4 = vld [vmem:[%s3137_s30 + $0x10] sm:$0xff]   ;;  %v1427_v12 = vrot.slane %v3053_v10, 3 }
  0x46   : > { %2636 = vmatprep.mubr.msk.bf16.mxu1 %vm3070_vm1, %v3069_v2  ;;  %v616_v11 = vshll.u32 %v3035_v4, 16  ;;  %v620_v19 = vshrl.u32 %v3035_v4, 16 }
  0x47   : > { %2721 = vmatmul.mubr.msk.bf16.gmra.mrb[4].mxu0 %vm349_vm3, %v1096_v17  ;;  %v1267_v17 = vrot.slane %v3230_v3, 1  ;;  %v1269_v3 = vrot.slane %v3236_v5, 1  ;;  %v1271_v5 = vrot.slane %v3252_v26, 1 }
  0x48   : > { %2724 = vmatprep.mubr.msk.bf16.mxu0 %vm3070_vm1, %v3069_v2  ;;  %v618_v63 = vrot.slane %v616_v11, 1  ;;  %v3052_v11 = vld [vmem:[%s3137_s30 + $0x84] sm:$0xff]  }
  0x49   : > { %v1268_v21 = vsel %vm1263_vm6, %v1265_v8, %v1267_v17  ;;  %v1272_v39 = vsel %vm1263_vm6, %v1269_v3, %v1271_v5  ;;  %v1425_v8 = vrot.slane %v3051_v6, 3 }
  0x4a   : > { %v619_v18 = vsel %vm599_vm4, %v614_v56, %v618_v63  ;;  %v622_v22 = vor.u32 %v620_v19, %v618_v63 }
  0x4c   : > { %v627_v25 = vsel %vm599_vm4, %v622_v22, %v626_v23  ;;  %v3059_v22 = vld [vmem:[%s3137_s30 + $0xb4] sm:$0xff]   ;;  %v3058_v23 = vld [vmem:[%s3137_s30 + $0x2c] ss:$0 sps:$4 sm:$0x33]  }
  0x4d   : > { %2637 = vmatmul.mubr.msk.bf16.gmra.mrb[8].mxu1 %vm349_vm3, %v3025_v31  ;;  %v1270_v31 = vsel %vm1263_vm6, %v1267_v17, %v1269_v3  ;;  %v3056_v17 = vld [vmem:[%s3137_s30 + $0xa4] sm:$0xff]   ;;  %v2148_v24 = vrot.slane %v3059_v22, 2  ;;  %v1585_v3 = vshll.u32 %v3058_v23, 16 }
  0x4e   : > { %2640 = vmatprep.mubr.msk.bf16.mxu1 %vm3070_vm1, %v3069_v2 }
  0x4f   : > { %2725 = vmatmul.mubr.msk.bf16.gmra.mrb[8].mxu0 %vm349_vm3, %v1104_v40  ;;  %v3042_v40 = vld [vmem:[%s3137_s30 + $0x2c] ss:$0 sps:$4 sm:$0x11]   ;;  %v2151_v33 = vsel %vm337_vm2, %v2148_v24, %v2150_v32 }
  0x50   : > { %2728 = vmatprep.mubr.msk.bf16.mxu0 %vm3070_vm1, %v3069_v2  ;;  %v1273_v26 = vrot.slane %v3042_v40, 1 }
  0x52   : > { %v1274_v46 = vsel %vm1263_vm6, %v1271_v5, %v1273_v26  ;;  %v277_v5 = vld [vmem:[%s3470_s28 + $0x2c] sm:$0xe]  ;;  %v1691_v26 = vlaneseq }
  0x53   : > { %v278_v38 = vsel %vm3473_vm14, 0, %v277_v5 }
  0x54   : > { %279 = vst [vmem:[%s3470_s28 + $0x2c] sm:$0xe] %v278_v38  ;;  %v3497_v48 = vshrl.u32 %v1691_v26, 7 }
  0x55   : > { %2641 = vmatmul.mubr.msk.bf16.gmra.mrb[12].mxu1 %vm349_vm3, %v3027_v45  ;;  %v643_v45 = vsel %vm599_vm4, %v638_v41, %v642_v42 }
  0x56   : > { %2644 = vmatprep.mubr.msk.bf16.mxu1 %vm3070_vm1, %v3069_v2  ;;  %v1694_v53 = vadd.s32 16, %v3497_v48  ;;  %v1696_v6 = vadd.s32 32, %v3497_v48  ;;  %v3571_v26 = vadd.s32 64, %v3497_v48 }
  0x57   : > { %2729 = vmatmul.mubr.msk.bf16.gmra.mrb[12].mxu0 %vm349_vm3, %v1112_v50  ;;  %v3043_v50 = vld [vmem:[%s3137_s30 + $0x64] sm:$0xff]  }
  0x58   : > { %2732 = vmatprep.mubr.msk.bf16.mxu0 %vm3070_vm1, %v3069_v2 }
  0x5d   : > { %2645 = vmatmul.mubr.msk.bf16.gmra.mrb[16].mxu1 %vm349_vm3, %v3029_v55  ;;  %v1420_v55 = vsel %vm1417_vm7, %v1418_v51, %v1419_v52  ;;  %v1693_v52 = vadd.s32 8, %v3497_v48 }
  0x5e   : > { %2650 = vmatprep.mubr.msk.bf16.mxu1 %vm3070_vm1, %v3069_v2 }
  0x5f   : > { %2733 = vmatmul.mubr.msk.bf16.gmra.mrb[16].mxu0 %vm349_vm3, %v1120_v62  ;;  %v3049_v62 = vld [vmem:[%s3137_s30 + $0x4c] sm:$0xff]  }
  0x60   : > { %2738 = vmatprep.mubr.msk.bf16.mxu0 %vm3070_vm1, %v3069_v2  ;;  %v1423_v1 = vrot.slane %v3049_v62, 3 }
  0x62   : > { %v1424_v4 = vsel %vm1417_vm7, %v1421_v60, %v1423_v1 }
  0x65   : > { %2651 = vmatmul.mubr.msk.bf16.vlgmr.msra.gmra.mrb[0].mxu1 %vm349_vm3, %v611_v9  ;;  %v1426_v9 = vsel %vm1417_vm7, %v1423_v1, %v1425_v8 }
  0x66   : > { %2654 = vmatprep.mubr.msk.bf16.mxu1 %vm3070_vm1, %v3069_v2  ;;  %2671 = vmatpush3.bf16.msra.mxu1 %v798_v13  ;;  %v3054_v13 = vld [vmem:[%s3137_s30 + $0x94] sm:$0xfc]  }
  0x67   : > { %2802 = vmatprep.subr.bf16.mxu1 %v3069_v2  ;;  %2739 = vmatmul.mubr.msk.bf16.vlgmr.msra.gmra.mrb[0].mxu0 %vm349_vm3, %v1266_v14  ;;  %v3055_v14 = vld [vmem:[%s3137_s30 + $0x9c] sm:$0xff]   ;;  %v2141_v56 = vrot.slane %v3054_v13, 2 }
  0x68   : > { %2759 = vmatpush3.bf16.msra.mxu0 %v1445_v15  ;;  %2742 = vmatprep.mubr.msk.bf16.mxu0 %vm3070_vm1, %v3069_v2  ;;  %v1428_v15 = vsel %vm1417_vm7, %v1425_v8, %v1427_v12  ;;  %v2142_v63 = vrot.slane %v3055_v14, 2  ;;  %v1697_v8 = vadd.s32 40, %v3497_v48 }
  0x69   : > { %2780 = vmatprep.subr.bf16.mxu0 %v3069_v2  ;;  %v3527_v12 = vmul.u32.u64.low 3435973837, %v1696_v6  ;;  %v3528_v13 = vmul.u32.u64.high 3435973837, %v1696_v6, %v3527_v12 }
  0x6a   : > { %v2143_v16 = vsel %vm337_vm2, %v2141_v56, %v2142_v63 }
  0x6b   : > { %v1752_v27 = vshrl.u32 %v3528_v13, 3 }
  0x6d   : > { %2655 = vmatmul.mubr.msk.bf16.gmra.mrb[4].mxu1 %vm349_vm3, %v619_v18  ;;  %v2144_v18 = vrot.slane %v3056_v17, 2 }
  0x6e   : > { %2658 = vmatprep.mubr.msk.bf16.mxu1 %vm3070_vm1, %v3069_v2 }
  0x6f   : > { %2743 = vmatmul.mubr.msk.bf16.gmra.mrb[4].mxu0 %vm349_vm3, %v1268_v21  ;;  %v2145_v19 = vsel %vm337_vm2, %v2142_v63, %v2144_v18  ;;  %v2146_v21 = vrot.slane %v3057_v20, 2 }
  0x70   : > { %2746 = vmatprep.mubr.msk.bf16.mxu0 %vm3070_vm1, %v3069_v2 }
  0x75   : > { %2659 = vmatmul.mubr.msk.bf16.gmra.mrb[8].mxu1 %vm349_vm3, %v627_v25  ;;  %v2149_v25 = vsel %vm337_vm2, %v2146_v21, %v2148_v24 }
  0x76   : > { %2662 = vmatprep.mubr.msk.bf16.mxu1 %vm3070_vm1, %v3069_v2 }
  0x77   : > { %2747 = vmatmul.mubr.msk.bf16.gmra.mrb[8].mxu0 %vm349_vm3, %v1270_v31  ;;  %v1587_v31 = vrot.slane %v1585_v3, 2 }
  0x78   : > { %2750 = vmatprep.mubr.msk.bf16.mxu0 %vm3070_vm1, %v3069_v2 }
  0x7d   : > { %2663 = vmatmul.mubr.msk.bf16.gmra.mrb[12].mxu1 %vm349_vm3, %v635_v35  ;;  %v3071_v35 = vmov 0  }
  0x7e   : > { %2666 = vmatprep.mubr.msk.bf16.mxu1 %vm3070_vm1, %v3069_v2  ;;  %282 = vst.msk [vmem:[%s3470_s28 + $0x34] sm:$0x7] %vm281_vm13, %v3071_v35 }
  0x7f   : > { %2751 = vmatmul.mubr.msk.bf16.gmra.mrb[12].mxu0 %vm349_vm3, %v1272_v39  ;;  %267 = vst.msk [vmem:[%s3470_s28] sm:$0xf] %vm266_vm15, %v3071_v35  ;;  %280 = vst.msk [vmem:[%s3470_s28 + $0x30] sm:$0xf] %vm266_vm15, %v3071_v35 }
  0x80   : > { %2754 = vmatprep.mubr.msk.bf16.mxu0 %vm3070_vm1, %v3069_v2 }
  0x85   : > { %2667 = vmatmul.mubr.msk.bf16.gmra.mrb[16].mxu1 %vm349_vm3, %v643_v45 }
  0x86   : > { %2672 = vmatprep.mubr.msk.bf16.mxu1 %vm3070_vm1, %v3069_v2 }
  0x87   : > { %2755 = vmatmul.mubr.msk.bf16.gmra.mrb[16].mxu0 %vm349_vm3, %v1274_v46 }
  0x88   : > { %2760 = vmatprep.mubr.msk.bf16.mxu0 %vm3070_vm1, %v3069_v2 }
  0x8d   : > { %2673 = vmatmul.mubr.msk.bf16.vlgmr.msra.gmra.mrb[0].mxu1 %vm349_vm3, %v3043_v50  ;;  %v3500_v50 = vmul.u32.u64.low 3435973837, %v3497_v48  ;;  %v3501_v51 = vmul.u32.u64.high 3435973837, %v3497_v48, %v3500_v50 }
  0x8e   : > { %2676 = vmatprep.mubr.msk.bf16.mxu1 %vm3070_vm1, %v3069_v2  ;;  %2803 = vmatpush3.bf16.msra.mxu1 %v2168_v54 }
  0x8f   : > { %2761 = vmatmul.mubr.msk.bf16.vlgmr.msra.gmra.mrb[0].mxu0 %vm349_vm3, %v1420_v55  ;;  %v1695_v55 = vadd.s32 24, %v3497_v48 }
  0x90   : > { %2781 = vmatpush3.bf16.msra.mxu0 %v1606_v58  ;;  %2764 = vmatprep.mubr.msk.bf16.mxu0 %vm3070_vm1, %v3069_v2 }
  0x95   : > { %2677 = vmatmul.mubr.msk.bf16.gmra.mrb[4].mxu1 %vm349_vm3, %v3046_v59  ;;  %v3510_v59 = vmul.u32.u64.low 3435973837, %v1693_v52  ;;  %v3511_v60 = vmul.u32.u64.high 3435973837, %v1693_v52, %v3510_v59 }
  0x96   : > { %2680 = vmatprep.mubr.msk.bf16.mxu1 %vm3070_vm1, %v3069_v2 }
  0x97   : > { %2765 = vmatmul.mubr.msk.bf16.gmra.mrb[4].mxu0 %vm349_vm3, %v1422_v61  ;;  %v1719_v56 = vshrl.u32 %v3511_v60, 3 }
  0x98   : > { %2768 = vmatprep.mubr.msk.bf16.mxu0 %vm3070_vm1, %v3069_v2 }
  0x9d   : > { %2681 = vmatmul.mubr.msk.bf16.gmra.mrb[8].mxu1 %vm349_vm3, %v3048_v0  ;;  %v3513_v62 = vmul.u32.u64.low 3435973837, %v1694_v53  ;;  %v3514_v0 = vmul.u32.u64.high 3435973837, %v1694_v53, %v3513_v62 }
  0x9e   : > { %2684 = vmatprep.mubr.msk.bf16.mxu1 %vm3070_vm1, %v3069_v2 }
  0x9f   : > { %2769 = vmatmul.mubr.msk.bf16.gmra.mrb[8].mxu0 %vm349_vm3, %v1424_v4  ;;  %v3516_v1 = vmul.u32.u64.low 3435973837, %v1695_v55  ;;  %v3517_v4 = vmul.u32.u64.high 3435973837, %v1695_v55, %v3516_v1 }
  0xa0   : > { %2772 = vmatprep.mubr.msk.bf16.mxu0 %vm3070_vm1, %v3069_v2 }
  0xa5   : > { %2685 = vmatmul.mubr.msk.bf16.gmra.mrb[12].mxu1 %vm349_vm3, %v3050_v7  ;;  %v1708_v7 = vshrl.u32 %v3501_v51, 3 }
  0xa6   : > { %2688 = vmatprep.mubr.msk.bf16.mxu1 %vm3070_vm1, %v3069_v2 }
  0xa7   : > { %2773 = vmatmul.mubr.msk.bf16.gmra.mrb[12].mxu0 %vm349_vm3, %v1426_v9  ;;  %v3523_v9 = vadd.s32 48, %v3497_v48 }
  0xa8   : > { %2776 = vmatprep.mubr.msk.bf16.mxu0 %vm3070_vm1, %v3069_v2 }
  0xad   : > { %2689 = vmatmul.mubr.msk.bf16.gmra.mrb[16].mxu1 %vm349_vm3, %v3052_v11 }
  0xae   : > { %2804 = vmatprep.mubr.msk.bf16.mxu1 %vm3070_vm1, %v3069_v2 }
  0xaf   : > { %2777 = vmatmul.mubr.msk.bf16.gmra.mrb[16].mxu0 %vm349_vm3, %v1428_v15  ;;  %v1709_v15 = vmul.u32 10, %v1708_v7 }
  0xb0   : > { %2782 = vmatprep.mubr.msk.bf16.mxu0 %vm3070_vm1, %v3069_v2 }
  0xb1   : > { %v1710_v22 = vsub.s32 %v3497_v48, %v1709_v15 }
  0xb3   : > { %vm1812_vm0 = vcmp.ne.s32.totalorder %v1710_v22, 0  ;;  %v1842_v35 = vadd.s32 10, %v1710_v22 }
  0xb5   : > { %2805 = vmatmul.mubr.msk.bf16.vlgmr.msra.gmra.mrb[20].mxu1 %vm349_vm3, %v2143_v16  ;;  %v3533_v63 = vmul.u32.u64.low 3435973837, %v1697_v8  ;;  %v3534_v16 = vmul.u32.u64.high 3435973837, %v1697_v8, %v3533_v63 }
  0xb6   : > { %2808 = vmatprep.mubr.msk.bf16.mxu1 %vm3070_vm1, %v3069_v2 }
  0xb7   : > { %2783 = vmatmul.mubr.msk.bf16.vlgmr.msra.gmra.mrb[0].mxu0 %vm349_vm3, %v3256_v29  ;;  %v2147_v29 = vsel %vm337_vm2, %v2144_v18, %v2146_v21  ;;  %v1730_v18 = vshrl.u32 %v3514_v0, 3  ;;  %v1741_v21 = vshrl.u32 %v3517_v4, 3 }
  0xb8   : > { %2786 = vmatprep.mubr.msk.bf16.mxu0 %vm3070_vm1, %v3069_v2  ;;  %v3604_v1 = vmul.u32.u64.low 3435973837, %v3571_v26  ;;  %v3605_v4 = vmul.u32.u64.high 3435973837, %v3571_v26, %v3604_v1 }
  0xb9   : > { %v1731_v24 = vmul.u32 10, %v1730_v18  ;;  %v1742_v3 = vmul.u32 10, %v1741_v21 }
  0xbd   : > { %2809 = vmatmul.mubr.msk.bf16.gmra.mrb[24].mxu1 %vm349_vm3, %v2145_v19  ;;  %v3538_v19 = vmul.u32.u64.low 3435973837, %v3523_v9  ;;  %v3539_v20 = vmul.u32.u64.high 3435973837, %v3523_v9, %v3538_v19 }
  0xbe   : > { %2812 = vmatprep.mubr.msk.bf16.mxu1 %vm3070_vm1, %v3069_v2 }
  0xbf   : > { %2787 = vmatmul.mubr.msk.bf16.gmra.mrb[4].mxu0 %vm349_vm3, %v3259_v30  ;;  %v1582_v30 = vshrl.u32 %v3058_v23, 16  ;;  %v1720_v23 = vmul.u32 10, %v1719_v56  ;;  %v1774_v5 = vshrl.u32 %v3539_v20, 3 }
  0xc0   : > { %2790 = vmatprep.mubr.msk.bf16.mxu0 %vm3070_vm1, %v3069_v2 }
  0xc1   : > { %v1584_v28 = vrot.slane %v1582_v30, 1 }
  0xc5   : > { %2813 = vmatmul.mubr.msk.bf16.gmra.mrb[28].mxu1 %vm349_vm3, %v2147_v29  ;;  %v3543_v29 = vadd.s32 56, %v3497_v48 }
  0xc6   : > { %2816 = vmatprep.mubr.msk.bf16.mxu1 %vm3070_vm1, %v3069_v2 }
  0xc7   : > { %2791 = vmatmul.mubr.msk.bf16.gmra.mrb[8].mxu0 %vm349_vm3, %v3268_v37  ;;  %v1588_v37 = vor.u32 %v1587_v31, %v1584_v28  ;;  %v3550_v28 = vmul.u32.u64.low 3435973837, %v3543_v29  ;;  %v3551_v31 = vmul.u32.u64.high 3435973837, %v3543_v29, %v3550_v28 }
  0xc8   : > { %2794 = vmatprep.mubr.msk.bf16.mxu0 %vm3070_vm1, %v3069_v2 }
  0xc9   : > { %v1589_v34 = vsel %vm1536_vm5, %v3273_v43, %v1588_v37  ;;  %v3555_v37 = vsub.s32 %v1693_v52, %v1720_v23  ;;  %v1785_v60 = vshrl.u32 %v3551_v31, 3 }
  0xcb   : > { %vm1823_vm4 = vcmp.lt.s32.totalorder %v3555_v37, 0  ;;  %v1843_v50 = vadd.s32 10, %v3555_v37  ;;  %v1786_v20 = vmul.u32 10, %v1785_v60 }
  0xcd   : > { %2817 = vmatmul.mubr.msk.bf16.gmra.mrb[32].mxu1 %vm349_vm3, %v2149_v25 }
  0xce   : > { %2820 = vmatprep.mubr.msk.bf16.mxu1 %vm3070_vm1, %v3069_v2 }
  0xcf   : > { %2795 = vmatmul.mubr.msk.bf16.gmra.mrb[12].mxu0 %vm349_vm3, %v3279_v44 }
  0xd0   : > { %2798 = vmatprep.mubr.msk.bf16.mxu0 %vm3070_vm1, %v3069_v2  ;;  %v271_v2 = vld [vmem:[%s3470_s28 + $0x4] sm:$0x3]  ;;  %vm1822_vm1 = vcmp.lt.s32.totalorder %v1710_v22, 0 }
  0xd1   : > { %v272_v36 = vsel %vm3463_vm11, 0, %v271_v2  ;;  %v3558_v2 = vsub.s32 %v1694_v53, %v1731_v24  ;;  %vm3564_vm2 = vmand %vm1822_vm1, %vm1812_vm0 }
  0xd2   : > { %273 = vst [vmem:[%s3470_s28 + $0x4] sm:$0x3] %v272_v36  ;;  %v3561_v36 = vsub.s32 %v1695_v55, %v1742_v3 }
  0xd3   : > { %vm1814_vm5 = vcmp.ne.s32.totalorder %v3558_v2, 0  ;;  %vm1824_vm6 = vcmp.lt.s32.totalorder %v3558_v2, 0  ;;  %v3579_v51 = vadd.s32 10, %v3558_v2 }
  0xd4   : > { %vm1815_vm7 = vcmp.ne.s32.totalorder %v3561_v36, 0  ;;  %vm1825_vm10 = vcmp.lt.s32.totalorder %v3561_v36, 0  ;;  %vm3597_vm12 = vmand %vm1824_vm6, %vm1814_vm5 }
  0xd5   : > { %2821 = vmatmul.mubr.msk.bf16.gmra.mrb[36].mxu1 %vm349_vm3, %v2151_v33  ;;  %v1763_v33 = vshrl.u32 %v3534_v16, 3  ;;  %vm3630_vm0 = vmand %vm1825_vm10, %vm1815_vm7  ;;  %v1854_v19 = vsel %vm3597_vm12, %v3579_v51, %v3558_v2  ;;  %vm1974_vm10 = vsmask.f32 5392 }
  0xd7   : > { %2799 = vmatmul.mubr.msk.bf16.gmra.mrb[16].mxu0 %vm349_vm3, %v1589_v34  ;;  %vm1813_vm3 = vcmp.ne.s32.totalorder %v3555_v37, 0 }
  0xd8   : > { %vm3587_vm8 = vmand %vm1823_vm4, %vm1813_vm3 }
  0xd9   : > { %v1853_v16 = vsel %vm3587_vm8, %v1843_v50, %v3555_v37 }
 0x160   : > { %v3489_v39 = vpop.f32.mrb[0].mxu1 }
 0x161   : > { %v2674_v40 = vpop.f32.mrb[1].mxu1 }
 0x162   : > { %v3491_v41 = vpop.f32.mrb[2].mxu1  ;;  %v1753_v40 = vmul.u32 10, %v1752_v27 }
 0x163   : > { %v2675_v42 = vpop.f32.mrb[3].mxu1 }
 0x164   : > { %v1764_v42 = vmul.u32 10, %v1763_v33 }
 0x166   : > { %v3601_v0 = vsub.s32 %v1697_v8, %v1764_v42 }
 0x168   : > { %v3493_v45 = vpop.f32.mrb[4].mxu1  ;;  %vm1817_vm3 = vcmp.ne.s32.totalorder %v3601_v0, 0  ;;  %vm1827_vm4 = vcmp.lt.s32.totalorder %v3601_v0, 0  ;;  %v1847_v33 = vadd.s32 10, %v3601_v0 }
 0x169   : > { %v2678_v46 = vpop.f32.mrb[5].mxu1  ;;  %vm3674_vm8 = vmand %vm1827_vm4, %vm1817_vm3 }
 0x16a   : > { %v3495_v47 = vpop.f32.mrb[6].mxu1  ;;  %v1775_v46 = vmul.u32 10, %v1774_v5 }
 0x16b   : > { %v2679_v49 = vpop.f32.mrb[7].mxu1 }
 0x16c   : > { %v1852_v49 = vsel %vm3564_vm2, %v1842_v35, %v1710_v22  ;;  %v3616_v8 = vsub.s32 %v3523_v9, %v1775_v46  ;;  %v3635_v9 = vadd.s32 72, %v3497_v48  ;;  %v3683_v35 = vsub.s32 %v3543_v29, %v1786_v20 }
 0x16d   : > { %vm3619_vm13 = vcmp.lt.s32.totalorder %v1852_v49, 8  ;;  %v1796_v46 = vshrl.u32 %v3605_v4, 3 }
 0x16e   : > { %vm1818_vm5 = vcmp.ne.s32.totalorder %v3616_v8, 0  ;;  %vm1828_vm6 = vcmp.lt.s32.totalorder %v3616_v8, 0  ;;  %v3671_v28 = vmul.u32.u64.low 3435973837, %v3635_v9  ;;  %v3672_v31 = vmul.u32.u64.high 3435973837, %v3635_v9, %v3671_v28 }
 0x16f   : > { %v3680_v2 = vadd.s32 10, %v3616_v8  ;;  %vm3690_vm12 = vmand %vm1828_vm6, %vm1818_vm5  ;;  %vm1829_vm3 = vcmp.lt.s32.totalorder %v3683_v35, 0 }
 0x170   : > { %v3505_v54 = vpop.f32.mrb[8].mxu1  ;;  %v1807_v20 = vshrl.u32 %v3672_v31, 3 }
 0x171   : > { %v2682_v57 = vpop.f32.mrb[9].mxu1 }
 0x172   : > { %v3508_v58 = vpop.f32.mrb[10].mxu1  ;;  %v3592_v57 = vsub.s32 %v1696_v6, %v1753_v40  ;;  %v3610_v6 = vld [vmem:[%s3904_s2] ss:$0 sm:$0xff] }
 0x173   : > { %v2683_v61 = vpop.f32.mrb[11].mxu1 }
 0x174   : > { %vm1816_vm1 = vcmp.ne.s32.totalorder %v3592_v57, 0  ;;  %vm1826_vm2 = vcmp.lt.s32.totalorder %v3592_v57, 0  ;;  %v1846_v24 = vadd.s32 10, %v3592_v57 }
 0x175   : > { %vm3666_vm7 = vmand %vm1826_vm2, %vm1816_vm1  ;;  %vm3699_vm1 = vcmp.lt.s32.totalorder %v1854_v19, 8 }
 0x178   : > { %v3525_v10 = vpop.f32.mrb[12].mxu1 }
 0x179   : > { %v2686_v11 = vpop.f32.mrb[13].mxu1 }
 0x17a   : > { %v3530_v14 = vpop.f32.mrb[14].mxu1  ;;  %v1845_v11 = vadd.s32 10, %v3561_v36 }
 0x17b   : > { %v2687_v17 = vpop.f32.mrb[15].mxu1 }
 0x17c   : > { %v1855_v23 = vsel %vm3630_vm0, %v1845_v11, %v3561_v36  ;;  %vm3695_vm0 = vcmp.lt.s32.totalorder %v1853_v16, 8  ;;  %v1858_v11 = vsel %vm3690_vm12, %v3680_v2, %v3616_v8 }
 0x17d   : > { %vm3703_vm2 = vcmp.lt.s32.totalorder %v1855_v23, 8 }
 0x180   : > { %v3546_v30 = vpop.f32.mrb[16].mxu1 }
 0x181   : > { %v2690_v25 = vpop.f32.mrb[17].mxu1 }
 0x182   : > { %v3553_v32 = vpop.f32.mrb[18].mxu1 }
 0x183   : > { %v2691_v34 = vpop.f32.mrb[19].mxu1 }
 0x188   : > { %v2204_v52 = vpop.f32.mrb[20].mxu1 }
 0x189   : > { %v2534_v55 = vpack.c.bf16 %v2204_v52, %v2204_v52  ;;  %v2806_v59 = vpop.f32.mrb[21].mxu1 }
 0x18a   : > { %v2207_v62 = vpop.f32.mrb[22].mxu1  ;;  %v1642_v7 = vpop.f32.mrb[0].mxu0 }
 0x18b   : > { %2283 = vst.msk [vmem:[%s3585_s7] sm:$0xf] %vm266_vm15, %v2534_v55  ;;  %v2535_v12 = vpack.c.bf16 %v2207_v62, %v2207_v62  ;;  %v2807_v13 = vpop.f32.mrb[23].mxu1  ;;  %v2824_v15 = vadd.f32 %v1642_v7, %v3489_v39  ;;  %v2784_v63 = vpop.f32.mrb[1].mxu0  ;;  %v3640_v39 = vld [vmem:[%s3905_s3] ss:$0 sm:$0xff]  ;;  %v1856_v62 = vsel %vm3666_vm7, %v1846_v24, %v3592_v57  ;;  %v1857_v7 = vsel %vm3674_vm8, %v1847_v33, %v3601_v0  ;;  %vm3759_vm7 = vmor %vm269_vm9, %vm1974_vm10 }
 0x18c   : > { %v1645_v18 = vpop.f32.mrb[2].mxu0  ;;  %vm3736_vm4 = vcmp.lt.s32.totalorder %v1856_v62, 8  ;;  %vm3745_vm5 = vcmp.lt.s32.totalorder %v1857_v7, 8  ;;  %vm3798_vm8 = vcmp.lt.s32.totalorder %v1858_v11, 8 }
 0x18d   : > { %2284 = vst.msk [vmem:[%s3585_s7 + $0x4] sm:$0xf] %vm266_vm15, %v2535_v12  ;;  %v1868_v48 = vmul.f32 %v2824_v15, %v3610_v6  ;;  %v2825_v21 = vadd.f32 %v1645_v18, %v3491_v41  ;;  %v2785_v22 = vpop.f32.mrb[3].mxu0  ;;  %v1797_v15 = vmul.u32 10, %v1796_v46  ;;  %v3733_v18 = vadd.s32 10, %v3683_v35 }
 0x18f   : > { %v1884_v3 = vadd.f32 %v3640_v39, %v1868_v48  ;;  %v1869_v25 = vmul.f32 %v2825_v21, %v3610_v6  ;;  %v3743_v28 = vsub.s32 %v3571_v26, %v1797_v15 }
 0x190   : > { %v2212_v27 = vpop.f32.mrb[24].mxu1 }
 0x191   : > { %v2536_v34 = vpack.c.bf16 %v2212_v27, %v2212_v27  ;;  %v2810_v5 = vpop.f32.mrb[25].mxu1  ;;  %v1894_v36 = vmax.f32 %v1884_v3, 0.0  ;;  %v1885_v38 = vadd.f32 %v3640_v39, %v1869_v25  ;;  %v2086_v3 = vld [vmem:[%s3470_s28 + $0x4] sm:$0xe]  ;;  %vm1820_vm9 = vcmp.ne.s32.totalorder %v3743_v28, 0 }
 0x192   : > { %v2215_v42 = vpop.f32.mrb[26].mxu1  ;;  %v1650_v29 = vpop.f32.mrb[4].mxu0 }
 0x193   : > { %2285 = vst.msk [vmem:[%s3585_s7 + $0x8] sm:$0xf] %vm266_vm15, %v2536_v34  ;;  %v2537_v52 = vpack.c.bf16 %v2215_v42, %v2215_v42  ;;  %v2811_v53 = vpop.f32.mrb[27].mxu1  ;;  %v1934_v55 = vsel %vm3619_vm13, %v1894_v36, 0.0  ;;  %v1895_v59 = vmax.f32 %v1885_v38, 0.0  ;;  %v2826_v60 = vadd.f32 %v1650_v29, %v3493_v45  ;;  %v2788_v61 = vpop.f32.mrb[5].mxu0 }
 0x194   : > { %v2524_v1 = vpack.c.bf16 %v1934_v55, %v1934_v55  ;;  %v1653_v4 = vpop.f32.mrb[6].mxu0  ;;  %vm1819_vm13 = vcmp.ne.s32.totalorder %v3683_v35, 0  ;;  %v1808_v55 = vmul.u32 10, %v1807_v20 }
 0x195   : > { %2286 = vst.msk [vmem:[%s3585_s7 + $0xc] sm:$0xf] %vm266_vm15, %v2537_v52  ;;  %v1935_v45 = vsel %vm3695_vm0, %v1895_v59, 0.0  ;;  %v1870_v57 = vmul.f32 %v2826_v60, %v3610_v6  ;;  %v2827_v12 = vadd.f32 %v1653_v4, %v3495_v47  ;;  %v2789_v13 = vpop.f32.mrb[7].mxu0  ;;  %vm3753_vm6 = vmand %vm1829_vm3, %vm1819_vm13 }
 0x196   : > { %v1977_v0 = vshrl.u32 %v2524_v1, 16  ;;  %v1980_v56 = vshll.u32 %v2524_v1, 16  ;;  %v2525_v63 = vpack.c.bf16 %v1935_v45, %v1935_v45  ;;  %v1859_v43 = vsel %vm3753_vm6, %v3733_v18, %v3683_v35 }
 0x197   : > { %v1886_v16 = vadd.f32 %v3640_v39, %v1870_v57  ;;  %v1871_v17 = vmul.f32 %v2827_v12, %v3610_v6  ;;  %vm3802_vm10 = vcmp.lt.s32.totalorder %v1859_v43, 8 }
 0x198   : > { %v2220_v19 = vpop.f32.mrb[28].mxu1  ;;  %v1979_v48 = vrot.slane %v1977_v0, 6  ;;  %v1982_v47 = vrot.slane %v1980_v56, 7  ;;  %v1986_v21 = vshrl.u32 %v2525_v63, 16  ;;  %v1989_v22 = vshll.u32 %v2525_v63, 16 }
 0x199   : > { %v2814_v24 = vpop.f32.mrb[29].mxu1  ;;  %v1896_v25 = vmax.f32 %v1886_v16, 0.0  ;;  %v1887_v41 = vadd.f32 %v3640_v39, %v1871_v17  ;;  %v2538_v27 = vpack.c.bf16 %v2220_v19, %v2220_v19  ;;  %v3790_v56 = vsub.s32 %v3635_v9, %v1808_v55 }
 0x19a   : > { %v2223_v37 = vpop.f32.mrb[30].mxu1  ;;  %v1983_v31 = vor.u32 %v1982_v47, %v1979_v48  ;;  %v1988_v33 = vrot.slane %v1986_v21, 6  ;;  %v1991_v34 = vrot.slane %v1989_v22, 7  ;;  %v1658_v5 = vpop.f32.mrb[8].mxu0 }
 0x19b   : > { %v2539_v26 = vpack.c.bf16 %v2223_v37, %v2223_v37  ;;  %v2815_v42 = vpop.f32.mrb[31].mxu1  ;;  %v1936_v49 = vsel %vm3699_vm1, %v1896_v25, 0.0  ;;  %v1897_v29 = vmax.f32 %v1887_v41, 0.0  ;;  %v2828_v52 = vadd.f32 %v1658_v5, %v3505_v54  ;;  %v2792_v53 = vpop.f32.mrb[9].mxu0  ;;  %2287 = vst.msk [vmem:[%s3585_s7 + $0x10] sm:$0xf] %vm266_vm15, %v2538_v27 }
 0x19c   : > { %v1984_v59 = vrot.slane %v1983_v31, 4  ;;  %v2087_v60 = vsel %vm3473_vm14, %v1983_v31, %v2086_v3  ;;  %v1992_v61 = vor.u32 %v1991_v34, %v1988_v33  ;;  %v2526_v62 = vpack.c.bf16 %v1936_v49, %v1936_v49  ;;  %v1661_v1 = vpop.f32.mrb[10].mxu0 }
 0x19d   : > { %2288 = vst.msk [vmem:[%s3585_s7 + $0x14] sm:$0xf] %vm266_vm15, %v2539_v26  ;;  %2088 = vst [vmem:[%s3470_s28 + $0x4] sm:$0xe] %v2087_v60  ;;  %v1937_v50 = vsel %vm3703_vm2, %v1897_v29, 0.0  ;;  %v1872_v54 = vmul.f32 %v2828_v52, %v3610_v6  ;;  %v2829_v4 = vadd.f32 %v1661_v1, %v3508_v58  ;;  %v2793_v7 = vpop.f32.mrb[11].mxu0 }
 0x19e   : > { %v1993_v45 = vsel %vm3759_vm7, %v1984_v59, %v1992_v61  ;;  %v1996_v57 = vshrl.u32 %v2526_v62, 16  ;;  %v1999_v12 = vshll.u32 %v2526_v62, 16  ;;  %v2527_v51 = vpack.c.bf16 %v1937_v50, %v1937_v50 }
 0x19f   : > { %2089 = vst.msk [vmem:[%s3470_s28 + $0x8] sm:$0xf] %vm266_vm15, %v1993_v45  ;;  %v1888_v13 = vadd.f32 %v3640_v39, %v1872_v54  ;;  %v1873_v58 = vmul.f32 %v2829_v4, %v3610_v6  ;;  %vm1830_vm14 = vcmp.lt.s32.totalorder %v3743_v28, 0  ;;  %v1994_v47 = vrot.slane %v1992_v61, 4 }
 0x1a0   : > { %v2228_v15 = vpop.f32.mrb[32].mxu1  ;;  %v1998_v0 = vrot.slane %v1996_v57, 6  ;;  %v2001_v35 = vrot.slane %v1999_v12, 7  ;;  %v2006_v17 = vshrl.u32 %v2527_v51, 16  ;;  %v2009_v18 = vshll.u32 %v2527_v51, 16  ;;  %vm3838_vm1 = vmand %vm1830_vm14, %vm1820_vm9 }
 0x1a1   : > { %v2540_v63 = vpack.c.bf16 %v2228_v15, %v2228_v15  ;;  %v2818_v16 = vpop.f32.mrb[33].mxu1  ;;  %v1898_v19 = vmax.f32 %v1888_v13, 0.0  ;;  %v1889_v20 = vadd.f32 %v3640_v39, %v1873_v58  ;;  %v3807_v3 = vadd.s32 10, %v3743_v28 }
 0x1a2   : > { %v2231_v48 = vpop.f32.mrb[34].mxu1  ;;  %v2002_v21 = vor.u32 %v2001_v35, %v1998_v0  ;;  %v1666_v22 = vpop.f32.mrb[12].mxu0  ;;  %v2008_v41 = vrot.slane %v2006_v17, 6  ;;  %v2011_v27 = vrot.slane %v2009_v18, 7  ;;  %vm1821_vm12 = vcmp.ne.s32.totalorder %v3790_v56, 0 }
 0x1a3   : > { %2289 = vst.msk [vmem:[%s3585_s7 + $0x18] sm:$0xf] %vm266_vm15, %v2540_v63  ;;  %v2541_v25 = vpack.c.bf16 %v2231_v48, %v2231_v48  ;;  %v2819_v40 = vpop.f32.mrb[35].mxu1  ;;  %v1938_v8 = vsel %vm3736_vm4, %v1898_v19, 0.0  ;;  %v1899_v2 = vmax.f32 %v1889_v20, 0.0  ;;  %v2796_v11 = vpop.f32.mrb[13].mxu0  ;;  %v2830_v34 = vadd.f32 %v1666_v22, %v3525_v10 }
 0x1a4   : > { %v2003_v37 = vsel %vm3759_vm7, %v1994_v47, %v2002_v21  ;;  %v2004_v31 = vrot.slane %v2002_v21, 4  ;;  %v2528_v33 = vpack.c.bf16 %v1938_v8, %v1938_v8  ;;  %v1669_v5 = vpop.f32.mrb[14].mxu0  ;;  %v2012_v38 = vor.u32 %v2011_v27, %v2008_v41 }
 0x1a5   : > { %2290 = vst.msk [vmem:[%s3585_s7 + $0x1c] sm:$0xf] %vm266_vm15, %v2541_v25  ;;  %2090 = vst.msk [vmem:[%s3470_s28 + $0xc] sm:$0xf] %vm266_vm15, %v2003_v37  ;;  %v1939_v23 = vsel %vm3745_vm5, %v1899_v2, 0.0  ;;  %v2831_v26 = vadd.f32 %v1669_v5, %v3530_v14  ;;  %v2797_v42 = vpop.f32.mrb[15].mxu0  ;;  %v1874_v10 = vmul.f32 %v2830_v34, %v3610_v6 }
 0x1a6   : > { %v2016_v49 = vshrl.u32 %v2528_v33, 16  ;;  %v2019_v29 = vshll.u32 %v2528_v33, 16  ;;  %v2529_v52 = vpack.c.bf16 %v1939_v23, %v1939_v23  ;;  %v2013_v53 = vsel %vm3759_vm7, %v2004_v31, %v2012_v38 }
 0x1a7   : > { %v1875_v55 = vmul.f32 %v2831_v26, %v3610_v6  ;;  %vm1831_vm0 = vcmp.lt.s32.totalorder %v3790_v56, 0  ;;  %v1851_v36 = vadd.s32 10, %v3790_v56  ;;  %2091 = vst.msk [vmem:[%s3470_s28 + $0x10] sm:$0xf] %vm266_vm15, %v2013_v53  ;;  %v2014_v50 = vrot.slane %v2012_v38, 4 }
 0x1a8   : > { %v2236_v59 = vpop.f32.mrb[36].mxu1  ;;  %v2018_v14 = vrot.slane %v2016_v49, 6  ;;  %v2021_v60 = vrot.slane %v2019_v29, 7  ;;  %v2026_v61 = vshrl.u32 %v2529_v52, 16  ;;  %v2029_v62 = vshll.u32 %v2529_v52, 16  ;;  %vm3847_vm2 = vmand %vm1831_vm0, %vm1821_vm12 }
 0x1a9   : > { %v2822_v1 = vpop.f32.mrb[37].mxu1  ;;  %v1890_v54 = vadd.f32 %v3640_v39, %v1874_v10  ;;  %v1891_v4 = vadd.f32 %v3640_v39, %v1875_v55  ;;  %v2542_v43 = vpack.c.bf16 %v2236_v59, %v2236_v59  ;;  %v1861_v27 = vsel %vm3847_vm2, %v1851_v36, %v3790_v56 }
 0x1aa   : > { %v2239_v45 = vpop.f32.mrb[38].mxu1  ;;  %v2022_v57 = vor.u32 %v2021_v60, %v2018_v14  ;;  %v2028_v12 = vrot.slane %v2026_v61, 6  ;;  %v2031_v51 = vrot.slane %v2029_v62, 7  ;;  %v1674_v13 = vpop.f32.mrb[16].mxu0  ;;  %vm1913_vm3 = vcmp.lt.s32.totalorder %v1861_v27, 8 }
 0x1ab   : > { %v2543_v58 = vpack.c.bf16 %v2239_v45, %v2239_v45  ;;  %v2823_v15 = vpop.f32.mrb[39].mxu1  ;;  %v1900_v0 = vmax.f32 %v1890_v54, 0.0  ;;  %v1901_v35 = vmax.f32 %v1891_v4, 0.0  ;;  %v2832_v63 = vadd.f32 %v1674_v13, %v3546_v30  ;;  %v2800_v16 = vpop.f32.mrb[17].mxu0  ;;  %2291 = vst.msk [vmem:[%s3585_s7 + $0x20] sm:$0xf] %vm266_vm15, %v2542_v43 }
 0x1ac   : > { %v2023_v18 = vsel %vm3759_vm7, %v2014_v50, %v2022_v57  ;;  %v2024_v19 = vrot.slane %v2022_v57, 4  ;;  %v2032_v20 = vor.u32 %v2031_v51, %v2028_v12  ;;  %v1860_v30 = vsel %vm3838_vm1, %v3807_v3, %v3743_v28  ;;  %v1677_v48 = vpop.f32.mrb[18].mxu0  ;;  %v2098_v45 = vld [vmem:[%s3470_s28 + $0x2c] sm:$0x3] }
 0x1ad   : > { %2292 = vst.msk [vmem:[%s3585_s7 + $0x24] sm:$0xf] %vm266_vm15, %v2543_v58  ;;  %2092 = vst.msk [vmem:[%s3470_s28 + $0x14] sm:$0xf] %vm266_vm15, %v2023_v18  ;;  %v1940_v47 = vsel %vm3798_vm8, %v1900_v0, 0.0  ;;  %v1941_v21 = vsel %vm3802_vm10, %v1901_v35, 0.0  ;;  %v1876_v22 = vmul.f32 %v2832_v63, %v3610_v6  ;;  %v2833_v25 = vadd.f32 %v1677_v48, %v3553_v32 }
 0x1ae   : > { %v2801_v40 = vpop.f32.mrb[19].mxu0  ;;  %v2033_v41 = vsel %vm3759_vm7, %v2024_v19, %v2032_v20  ;;  %v2530_v28 = vpack.c.bf16 %v1940_v47, %v1940_v47  ;;  %v2531_v3 = vpack.c.bf16 %v1941_v21, %v1941_v21  ;;  %vm1912_vm13 = vcmp.lt.s32.totalorder %v1860_v30, 8 }
 0x1af   : > { %2093 = vst.msk [vmem:[%s3470_s28 + $0x18] sm:$0xf] %vm266_vm15, %v2033_v41  ;;  %v1892_v24 = vadd.f32 %v3640_v39, %v1876_v22  ;;  %v1877_v9 = vmul.f32 %v2833_v25, %v3610_v6  ;;  %v2034_v26 = vrot.slane %v2032_v20, 4 }
 0x1b0   : > { %v2036_v8 = vshrl.u32 %v2530_v28, 16  ;;  %v2039_v2 = vshll.u32 %v2530_v28, 16  ;;  %v2046_v32 = vshrl.u32 %v2531_v3, 16  ;;  %v2049_v11 = vshll.u32 %v2531_v3, 16 }
 0x1b1   : > { %v1902_v37 = vmax.f32 %v1892_v24, 0.0  ;;  %v1893_v31 = vadd.f32 %v3640_v39, %v1877_v9 }
 0x1b2   : > { %v2038_v33 = vrot.slane %v2036_v8, 6  ;;  %v2041_v34 = vrot.slane %v2039_v2, 7  ;;  %v2048_v5 = vrot.slane %v2046_v32, 6  ;;  %v2051_v56 = vrot.slane %v2049_v11, 7 }
 0x1b3   : > { %v1942_v38 = vsel %vm1912_vm13, %v1902_v37, 0.0  ;;  %v1903_v23 = vmax.f32 %v1893_v31, 0.0 }
 0x1b4   : > { %v2042_v42 = vor.u32 %v2041_v34, %v2038_v33  ;;  %v2052_v49 = vor.u32 %v2051_v56, %v2048_v5  ;;  %v2532_v6 = vpack.c.bf16 %v1942_v38, %v1942_v38 }
 0x1b5   : > { %v1943_v29 = vsel %vm1913_vm3, %v1903_v23, 0.0 }
 0x1b6   : > { %v2043_v52 = vsel %vm3759_vm7, %v2034_v26, %v2042_v42  ;;  %v2044_v10 = vrot.slane %v2042_v42, 4  ;;  %v2056_v53 = vshrl.u32 %v2532_v6, 16  ;;  %v2059_v39 = vshll.u32 %v2532_v6, 16 }
 0x1b7   : > { %2094 = vst.msk [vmem:[%s3470_s28 + $0x1c] sm:$0xf] %vm266_vm15, %v2043_v52  ;;  %v2533_v55 = vpack.c.bf16 %v1943_v29, %v1943_v29  ;;  %v2054_v62 = vrot.slane %v2052_v49, 4 }
 0x1b8   : > { %v2053_v36 = vsel %vm3759_vm7, %v2044_v10, %v2052_v49  ;;  %v2058_v59 = vrot.slane %v2056_v53, 6  ;;  %v2061_v14 = vrot.slane %v2059_v39, 7 }
 0x1b9   : > { %2095 = vst.msk [vmem:[%s3470_s28 + $0x20] sm:$0xf] %vm266_vm15, %v2053_v36  ;;  %v2066_v60 = vshrl.u32 %v2533_v55, 16  ;;  %v2069_v61 = vshll.u32 %v2533_v55, 16 }
 0x1ba   : > { %v2062_v1 = vor.u32 %v2061_v14, %v2058_v59 }
 0x1bb   : > { %v2068_v50 = vrot.slane %v2066_v60, 6  ;;  %v2071_v54 = vrot.slane %v2069_v61, 7 }
 0x1bc   : > { %v2063_v4 = vsel %vm3759_vm7, %v2054_v62, %v2062_v1  ;;  %v2064_v7 = vrot.slane %v2062_v1, 4 }
 0x1bd   : > { %v2072_v43 = vor.u32 %v2071_v54, %v2068_v50  ;;  %2096 = vst.msk [vmem:[%s3470_s28 + $0x24] sm:$0xf] %vm266_vm15, %v2063_v4 }
 0x1bf   : > { %v2073_v57 = vsel %vm3759_vm7, %v2064_v7, %v2072_v43  ;;  %v2074_v12 = vrot.slane %v2072_v43, 4 }
 0x1c0   : > { %2097 = vst.msk [vmem:[%s3470_s28 + $0x28] sm:$0xf] %vm266_vm15, %v2073_v57 }
 0x1c1   : > { %v2099_v51 = vsel %vm3463_vm11, %v2074_v12, %v2098_v45 }
 0x1c2   : > { %2100 = vst [vmem:[%s3470_s28 + $0x2c] sm:$0x3] %v2099_v51 }
 0x1c3 PF: > { %s17_s21 = sadd.s32 1, %s3067_s21  }
 0x1c4   : > { %p14_p4 = scmp.ge.s32.totalorder %s17_s21, 4  }
 0x1c6   :  { %16 = sbr.rel (!%p14_p4) target bundleno = 1 (0x1), region = 90 }

</bundles_post_ra>
